<compile_context>
chip_gen: v6e
topology: v6e:2x2x1
jax: 0.10.0
libtpu: 0.0.40
codegen_flags: <defaults>
</compile_context>

<pallas_src>
import functools

import jax
import jax.numpy as jnp
from jax import lax
from jax.experimental import pallas as pl
from jax.experimental.pallas import tpu as pltpu

NODE_IN_DIM = 2     # data.x feature dim (in_dim=2 in the module)
EDGE_DIM = 1        # raw edge_attr dim
NODE_EMB = 32       # node_emb_dim
EDGE_EMB = 8        # edge_emb_dim
NUM_LAYERS = 4
LN_EPS = 1e-5


# ---------------------------------------------------------------------------
# Pallas kernel
# ---------------------------------------------------------------------------
def mp_election_kernel(
        x_ref, eattr_ref,
        ds_col_ref, dst_row_ref, cand_col_ref, cbatch_row_ref,
        win_n_ref, bin_n_ref, win_e_ref, bin_e_ref,
        W1_ref, b1_ref, mlng_ref, mlnb_ref, elng_ref, elnb_ref,
        W2_ref, b2_ref, wout_ref, bout_ref,
        out_ref,
        *, num_layers, num_graphs):
    f32, bf16 = jnp.float32, jnp.bfloat16
    E2 = ds_col_ref.shape[0]
    E = E2 // 2
    N = x_ref.shape[0]
    C = cand_col_ref.shape[0]
    G = num_graphs
    NE, EE = NODE_EMB, EDGE_EMB

    def dot16(a, b):
        # bf16 operands, f32 MXU accumulation (v5e has no native f32 MXU path).
        return jnp.dot(a.astype(bf16), b.astype(bf16), preferred_element_type=f32)

    def layer_norm(v, g, b):                        # f32
        mu = jnp.mean(v, axis=-1, keepdims=True)
        vc = v - mu
        var = jnp.mean(vc * vc, axis=-1, keepdims=True)
        return vc * lax.rsqrt(var + LN_EPS) * g + b

    # --- gather / scatter operators: 0/1 (exact in bf16), built once --------
    gather_both = (ds_col_ref[...] ==
                   lax.broadcasted_iota(jnp.int32, (E2, N), 1)
                   ).astype(f32).astype(bf16)                       # [2E,N] dst rows then src
    scatter_dst = (lax.broadcasted_iota(jnp.int32, (N, E), 0) ==
                   dst_row_ref[...]).astype(f32).astype(bf16)       # [N,E] sum-at-dst
    gather_cand = (cand_col_ref[...] ==
                   lax.broadcasted_iota(jnp.int32, (C, N), 1)).astype(f32)  # [C,N] (f32 head)

    # --- input embeddings (edge one is elementwise since edge_dim == 1) -----
    x = dot16(x_ref[...], win_n_ref[...]) + bin_n_ref[...]          # [N,32] f32
    e = eattr_ref[...] * win_e_ref[...] + bin_e_ref[...]            # [E,8]  f32

    # --- message-passing layers ----------------------------------------------
    for l in range(num_layers):
        # fused gather: rows 0:E = x[to] (= x_i), rows E:2E = x[from] (= x_j)
        xg = dot16(gather_both, x)                                  # [2E,32]
        feat = jnp.concatenate([xg[:E], xg[E:], e], axis=-1)        # [E,72] = [x_i, x_j, e]

        # fused stage-1: cols 0:32 = message MLP, cols 32:40 = edge-utility MLP
        h1 = dot16(feat, W1_ref[l]) + b1_ref[l]                     # [E,40] f32
        m = jnp.maximum(layer_norm(h1[:, :NE], mlng_ref[l], mlnb_ref[l]), 0.0)
        u = jnp.maximum(layer_norm(h1[:, NE:NE + EE], elng_ref[l], elnb_ref[l]), 0.0)

        # fused stage-2: block-diagonal [40,40] weight
        h2 = dot16(jnp.concatenate([m, u], axis=-1), W2_ref[l]) + b2_ref[l]   # [E,40]

        aggr = dot16(scatter_dst, h2[:, :NE])                       # [N,32] scatter-add at dst
        x = 2.0 * x + aggr                   # x <- x + (x + aggregated messages)
        e = 2.0 * e + h2[:, NE:NE + EE]      # e <- e + (e + edge_utility_mlp)

    # --- output head (f32) over candidates, row layout [1,C] -----------------
    cand_x = jnp.dot(gather_cand, x, preferred_element_type=f32)    # [C,32]
    logits = lax.dot_general(wout_ref[...], cand_x,
                             (((1,), (1,)), ((), ())),
                             preferred_element_type=f32) + bout_ref[...]  # [1,C]

    # --- scatter_log_softmax over graphs (f32, empty-graph NaN guard) --------
    seg_mask = (lax.broadcasted_iota(jnp.int32, (G, C), 0)
                == cbatch_row_ref[...])                             # [G,C]
    seg_f = seg_mask.astype(f32)
    masked = jnp.where(seg_mask, logits, jnp.float32(-1e30))        # [G,C]
    seg_max = jnp.max(masked, axis=1, keepdims=True)                # [G,1]
    gmax = jnp.sum(seg_f * seg_max, axis=0, keepdims=True)          # [1,C]
    shifted = logits - gmax
    ev = jnp.exp(shifted)                                           # [1,C]
    seg_sum = jnp.sum(seg_f * ev, axis=1, keepdims=True)            # [G,1]
    seg_cnt = jnp.sum(seg_f, axis=1, keepdims=True)                 # [G,1]
    safe_sum = jnp.where(seg_cnt > 0.0, seg_sum, 1.0)               # avoid log(0)*0 -> NaN
    log_den = jnp.sum(seg_f * jnp.log(safe_sum), axis=0, keepdims=True)  # [1,C]
    out_ref[...] = shifted - log_den                                # [1,C] log-probs


# ---------------------------------------------------------------------------
# Host-side param fusion / permutation / bf16 casting
# ---------------------------------------------------------------------------
def prepare_kernel_params(p):
    ne, ee = NODE_EMB, EDGE_EMB
    # edge_utility_mlp consumes [x_src, x_dst, e]; the kernel feeds the shared
    # concat [x_dst, x_src, e], so permute eW1's input rows accordingly.
    eW1p = jnp.concatenate([p["eW1"][:, ne:2 * ne, :],
                            p["eW1"][:, :ne, :],
                            p["eW1"][:, 2 * ne:, :]], axis=1)                  # [L,72,8]
    W1f = jnp.concatenate([p["mW1"], eW1p], axis=2).astype(jnp.bfloat16)       # [L,72,40]
    b1f = jnp.concatenate([p["mb1"], p["eb1"]], axis=2)                        # [L,1,40]
    L = p["mW2"].shape[0]
    z_tr = jnp.zeros((L, ne, ee), jnp.float32)
    z_bl = jnp.zeros((L, ee, ne), jnp.float32)
    W2b = jnp.concatenate([jnp.concatenate([p["mW2"], z_tr], axis=2),
                           jnp.concatenate([z_bl, p["eW2"]], axis=2)],
                          axis=1).astype(jnp.bfloat16)                         # [L,40,40]
    b2f = jnp.concatenate([p["mb2"], p["eb2"]], axis=2)                        # [L,1,40]
    return dict(
        Win_node=p["Win_node"].astype(jnp.bfloat16), bin_node=p["bin_node"],
        Win_edge=p["Win_edge"], bin_edge=p["bin_edge"],
        W1f=W1f, b1f=b1f, mlng=p["mlng"], mlnb=p["mlnb"],
        elng=p["elng"], elnb=p["elnb"], W2b=W2b, b2f=b2f,
        Wout_row=p["Wout_row"], bout=p["bout"])


# ---------------------------------------------------------------------------
# Wrapper
# ---------------------------------------------------------------------------
def mp_election_forward(node_x, edge_index, edge_attr, candidate_idxs, batch,
                        params, num_graphs):
    kp = prepare_kernel_params(params)
    E = edge_attr.shape[0]
    C = candidate_idxs.shape[0]
    src = edge_index[0].astype(jnp.int32)
    dst = edge_index[1].astype(jnp.int32)
    cand = candidate_idxs.astype(jnp.int32)
    cand_batch = batch.astype(jnp.int32)[cand]

    inputs = (
        node_x.astype(jnp.float32),
        edge_attr.astype(jnp.float32),
        jnp.concatenate([dst, src]).reshape(2 * E, 1),   # fused gather operator (dst, then src)
        dst.reshape(1, E),                               # scatter-add target rows
        cand.reshape(C, 1),
        cand_batch.reshape(1, C),
        kp["Win_node"], kp["bin_node"], kp["Win_edge"], kp["bin_edge"],
        kp["W1f"], kp["b1f"], kp["mlng"], kp["mlnb"], kp["elng"], kp["elnb"],
        kp["W2b"], kp["b2f"],
        kp["Wout_row"], kp["bout"],
    )

    kernel = functools.partial(mp_election_kernel,
                               num_layers=NUM_LAYERS, num_graphs=num_graphs)

    out = pl.pallas_call(
        kernel,
        out_shape=jax.ShapeDtypeStruct((1, C), jnp.float32),
        in_specs=[pl.BlockSpec(memory_space=pltpu.MemorySpace.VMEM)] * len(inputs),
        out_specs=pl.BlockSpec(memory_space=pltpu.MemorySpace.VMEM),
        compiler_params=pltpu.CompilerParams(vmem_limit_bytes=4 * 1024 * 1024),
    )(*inputs)
    return out[0]    # [C] per-candidate log-probabilities


# ---------------------------------------------------------------------------
# Deterministic parameter init (mirrors nn.Linear / nn.LayerNorm shapes;
# Linear weights stored [in, out] so forward is  x @ W + b)
# ---------------------------------------------------------------------------
def _linear(key, fan_in, fan_out):
    kw, kb = jax.random.split(key)
    bound = 1.0 / (fan_in ** 0.5)
    W = jax.random.uniform(kw, (fan_in, fan_out), jnp.float32, -bound, bound)
    b = jax.random.uniform(kb, (1, fan_out), jnp.float32, -bound, bound)
    return W, b


def _layer_norm(key, dim):
    kg, kb = jax.random.split(key)
    g = jax.random.uniform(kg, (1, dim), jnp.float32, 0.8, 1.2)
    b = jax.random.uniform(kb, (1, dim), jnp.float32, -0.1, 0.1)
    return g, b


def init_params(key):
    keys = iter(jax.random.split(key, 3 + 6 * NUM_LAYERS))
    p = {}
    p["Win_node"], p["bin_node"] = _linear(next(keys), NODE_IN_DIM, NODE_EMB)
    p["Win_edge"], p["bin_edge"] = _linear(next(keys), EDGE_DIM, EDGE_EMB)

    names = ["mW1", "mb1", "mlng", "mlnb", "mW2", "mb2",
             "eW1", "eb1", "elng", "elnb", "eW2", "eb2"]
    acc = {k: [] for k in names}
    cat_dim = 2 * NODE_EMB + EDGE_EMB
    for _ in range(NUM_LAYERS):
        w, b = _linear(next(keys), cat_dim, NODE_EMB); acc["mW1"].append(w); acc["mb1"].append(b)
        g, b2 = _layer_norm(next(keys), NODE_EMB);     acc["mlng"].append(g); acc["mlnb"].append(b2)
        w, b = _linear(next(keys), NODE_EMB, NODE_EMB); acc["mW2"].append(w); acc["mb2"].append(b)
        w, b = _linear(next(keys), cat_dim, EDGE_EMB);  acc["eW1"].append(w); acc["eb1"].append(b)
        g, b2 = _layer_norm(next(keys), EDGE_EMB);      acc["elng"].append(g); acc["elnb"].append(b2)
        w, b = _linear(next(keys), EDGE_EMB, EDGE_EMB); acc["eW2"].append(w); acc["eb2"].append(b)
    for k, v in acc.items():
        p[k] = jnp.stack(v)

    w, b = _linear(next(keys), NODE_EMB, 1)
    p["Wout_row"], p["bout"] = w.T, b      # [1,32] row so logits come out [1,C]
    return p


# ---------------------------------------------------------------------------
# Pure-JAX reference.  mxu_bf16=False  -> full-f32 (Precision.HIGHEST) math.
#                      mxu_bf16=True   -> mirrors the kernel's precision
#                      choices (bf16 MXU operands, f32 accumulation, f32
#                      LN / residuals / head / log-softmax).
# ---------------------------------------------------------------------------
def reference_forward(node_x, edge_index, edge_attr, candidate_idxs, batch,
                      params, num_graphs, *, mxu_bf16=False):
    hp = jax.lax.Precision.HIGHEST

    def mm(a, b):
        if mxu_bf16:
            return jnp.dot(a.astype(jnp.bfloat16), b.astype(jnp.bfloat16),
                           preferred_element_type=jnp.float32)
        return jnp.dot(a, b, precision=hp)

    def rnd(v):      # value the kernel feeds to the MXU as a bf16 operand
        return v.astype(jnp.bfloat16).astype(jnp.float32) if mxu_bf16 else v

    def layer_norm(v, g, b):
        mu = jnp.mean(v, axis=-1, keepdims=True)
        var = jnp.mean((v - mu) ** 2, axis=-1, keepdims=True)
        return (v - mu) * jax.lax.rsqrt(var + LN_EPS) * g + b

    src, dst = edge_index[0], edge_index[1]
    N = node_x.shape[0]

    x = mm(node_x, params["Win_node"]) + params["bin_node"]
    e = jnp.dot(edge_attr, params["Win_edge"], precision=hp) + params["bin_edge"]
    for l in range(NUM_LAYERS):
        x_i, x_j = x[dst], x[src]          # i = target (to_node), j = source (from_node)
        m = mm(jnp.concatenate([x_i, x_j, e], axis=-1), params["mW1"][l]) + params["mb1"][l]
        m = jax.nn.relu(layer_norm(m, params["mlng"][l], params["mlnb"][l]))
        m = mm(m, params["mW2"][l]) + params["mb2"][l]
        aggr = jax.ops.segment_sum(rnd(m), dst, num_segments=N)

        u = mm(jnp.concatenate([x_j, x_i, e], axis=-1), params["eW1"][l]) + params["eb1"][l]
        u = jax.nn.relu(layer_norm(u, params["elng"][l], params["elnb"][l]))
        u = mm(u, params["eW2"][l]) + params["eb2"][l]

        x = 2.0 * x + aggr                 # x + (x + aggregated messages)
        e = 2.0 * e + u                    # e + (e + edge_utility_mlp)

    cand_x = x[candidate_idxs]
    logits = (jnp.dot(cand_x, params["Wout_row"].T, precision=hp) + params["bout"])[:, 0]
    cb = batch[candidate_idxs]
    seg_max = jax.ops.segment_max(logits, cb, num_segments=num_graphs)
    shifted = logits - seg_max[cb]
    seg_sum = jax.ops.segment_sum(jnp.exp(shifted), cb, num_segments=num_graphs)
    return shifted - jnp.log(seg_sum)[cb]


# ---------------------------------------------------------------------------
if __name__ == "__main__":
    NUM_GRAPHS = 2
    NODES_PER_GRAPH = 5
    N = NUM_GRAPHS * NODES_PER_GRAPH

    key = jax.random.PRNGKey(0)
    k_x, k_e, k_p = jax.random.split(key, 3)

    # two small graphs batched into one call (directed ring + chords each)
    src0 = jnp.array([0, 1, 2, 3, 4, 0, 1, 2], dtype=jnp.int32)
    dst0 = jnp.array([1, 2, 3, 4, 0, 2, 3, 4], dtype=jnp.int32)
    src = jnp.concatenate([src0 + g * NODES_PER_GRAPH for g in range(NUM_GRAPHS)])
    dst = jnp.concatenate([dst0 + g * NODES_PER_GRAPH for g in range(NUM_GRAPHS)])
    edge_index = jnp.stack([src, dst])                           # [2, 16], E multiple of 8

    node_x = jax.random.normal(k_x, (N, NODE_IN_DIM), jnp.float32)
    edge_attr = jax.random.normal(k_e, (edge_index.shape[1], EDGE_DIM), jnp.float32)
    batch = jnp.repeat(jnp.arange(NUM_GRAPHS, dtype=jnp.int32), NODES_PER_GRAPH)
    candidate_idxs = jnp.array([1, 2, 3, 6, 7, 8], dtype=jnp.int32)   # 3 per graph
    cand_batch = batch[candidate_idxs]
    C = candidate_idxs.shape[0]

    params = init_params(k_p)

    log_probs = mp_election_forward(node_x, edge_index, edge_attr,
                                    candidate_idxs, batch, params, NUM_GRAPHS)
    log_probs = jax.block_until_ready(log_probs)

    ref_bf16 = reference_forward(node_x, edge_index, edge_attr, candidate_idxs,
                                 batch, params, NUM_GRAPHS, mxu_bf16=True)
    ref_f32 = reference_forward(node_x, edge_index, edge_attr, candidate_idxs,
                                batch, params, NUM_GRAPHS, mxu_bf16=False)

    assert log_probs.shape == (C,)
    assert bool(jnp.all(jnp.isfinite(log_probs)))
    # per-graph probabilities sum to 1 (scatter_log_softmax semantics)
    prob_sums = jax.ops.segment_sum(jnp.exp(log_probs), cand_batch,
                                    num_segments=NUM_GRAPHS)
    assert bool(jnp.allclose(prob_sums, 1.0, atol=1e-4)), prob_sums
    # tight agreement with the precision-matched reference (same bf16 MXU
    # operands / f32 accumulation as the kernel)
    assert bool(jnp.allclose(log_probs, ref_bf16, atol=2e-2, rtol=2e-2)), (log_probs, ref_bf16)
    # agreement with the full-f32 reference up to bf16 operand rounding,
    # which is amplified by the model's 2x-per-layer residual updates
    assert bool(jnp.allclose(log_probs, ref_f32, atol=0.5, rtol=0.1)), (log_probs, ref_f32)
    # same per-graph winner as the precision-matched reference (election())
    grp = cand_batch[:, None] == jnp.arange(NUM_GRAPHS)[None, :]
    win_k = jnp.argmax(jnp.where(grp, log_probs[:, None], -jnp.inf), axis=0)
    win_r = jnp.argmax(jnp.where(grp, ref_bf16[:, None], -jnp.inf), axis=0)
    assert bool(jnp.all(win_k == win_r))

    print("KERNEL_OK")
</pallas_src>

<mosaic_0001>
module attributes {stable_mosaic.version = 11 : i64} {
  func.func @mp_election_kernel(%arg0: memref<10x2xf32, #tpu.memory_space<vmem>>, %arg1: memref<16x1xf32, #tpu.memory_space<vmem>>, %arg2: memref<32x1xi32, #tpu.memory_space<vmem>>, %arg3: memref<1x16xi32, #tpu.memory_space<vmem>>, %arg4: memref<6x1xi32, #tpu.memory_space<vmem>>, %arg5: memref<1x6xi32, #tpu.memory_space<vmem>>, %arg6: memref<2x32xbf16, #tpu.memory_space<vmem>>, %arg7: memref<1x32xf32, #tpu.memory_space<vmem>>, %arg8: memref<1x8xf32, #tpu.memory_space<vmem>>, %arg9: memref<1x8xf32, #tpu.memory_space<vmem>>, %arg10: memref<4x72x40xbf16, #tpu.memory_space<vmem>>, %arg11: memref<4x1x40xf32, #tpu.memory_space<vmem>>, %arg12: memref<4x1x32xf32, #tpu.memory_space<vmem>>, %arg13: memref<4x1x32xf32, #tpu.memory_space<vmem>>, %arg14: memref<4x1x8xf32, #tpu.memory_space<vmem>>, %arg15: memref<4x1x8xf32, #tpu.memory_space<vmem>>, %arg16: memref<4x40x40xbf16, #tpu.memory_space<vmem>>, %arg17: memref<4x1x40xf32, #tpu.memory_space<vmem>>, %arg18: memref<1x32xf32, #tpu.memory_space<vmem>>, %arg19: memref<1x1xf32, #tpu.memory_space<vmem>>, %arg20: memref<1x6xf32, #tpu.memory_space<vmem>>) attributes {dimension_semantics = [], scalar_prefetch = 0 : i64, scratch_operands = 0 : i64, tpu.core_type = #tpu.core_type<tc>} {
    %c0 = arith.constant 0 : index
    %c0_0 = arith.constant 0 : index
    %0 = vector.load %arg2[%c0, %c0_0] : memref<32x1xi32, #tpu.memory_space<vmem>>, vector<32x1xi32>
    %1 = tpu.iota {dimensions = array<i32: 1>} : vector<32x10xi32>
    %2 = vector.broadcast %0 : vector<32x1xi32> to vector<32x10xi32>
    %3 = arith.cmpi eq, %2, %1 : vector<32x10xi32>
    %4 = arith.extui %3 : vector<32x10xi1> to vector<32x10xi32>
    %5 = arith.sitofp %4 : vector<32x10xi32> to vector<32x10xf32>
    %6 = arith.truncf %5 : vector<32x10xf32> to vector<32x10xbf16>
    %7 = tpu.iota {dimensions = array<i32: 0>} : vector<10x16xi32>
    %c0_1 = arith.constant 0 : index
    %c0_2 = arith.constant 0 : index
    %8 = vector.load %arg3[%c0_1, %c0_2] : memref<1x16xi32, #tpu.memory_space<vmem>>, vector<1x16xi32>
    %9 = vector.broadcast %8 : vector<1x16xi32> to vector<10x16xi32>
    %10 = arith.cmpi eq, %7, %9 : vector<10x16xi32>
    %11 = arith.extui %10 : vector<10x16xi1> to vector<10x16xi32>
    %12 = arith.sitofp %11 : vector<10x16xi32> to vector<10x16xf32>
    %13 = arith.truncf %12 : vector<10x16xf32> to vector<10x16xbf16>
    %c0_3 = arith.constant 0 : index
    %c0_4 = arith.constant 0 : index
    %14 = vector.load %arg4[%c0_3, %c0_4] : memref<6x1xi32, #tpu.memory_space<vmem>>, vector<6x1xi32>
    %15 = tpu.iota {dimensions = array<i32: 1>} : vector<6x10xi32>
    %16 = vector.broadcast %14 : vector<6x1xi32> to vector<6x10xi32>
    %17 = arith.cmpi eq, %16, %15 : vector<6x10xi32>
    %18 = arith.extui %17 : vector<6x10xi1> to vector<6x10xi32>
    %19 = arith.sitofp %18 : vector<6x10xi32> to vector<6x10xf32>
    %c0_5 = arith.constant 0 : index
    %c0_6 = arith.constant 0 : index
    %20 = vector.load %arg0[%c0_5, %c0_6] : memref<10x2xf32, #tpu.memory_space<vmem>>, vector<10x2xf32>
    %c0_7 = arith.constant 0 : index
    %c0_8 = arith.constant 0 : index
    %21 = vector.load %arg6[%c0_7, %c0_8] : memref<2x32xbf16, #tpu.memory_space<vmem>>, vector<2x32xbf16>
    %22 = arith.truncf %20 : vector<10x2xf32> to vector<10x2xbf16>
    %cst = arith.constant dense<0.000000e+00> : vector<10x32xf32>
    %23 = tpu.matmul %22, %21, %cst {dimension_numbers = #tpu.dot_dimension_numbers<[1], [0], [0], [1], [0, 0, 1, 1], [], []>} : vector<10x2xbf16>, vector<2x32xbf16>, vector<10x32xf32> -> vector<10x32xf32>
    %c0_9 = arith.constant 0 : index
    %c0_10 = arith.constant 0 : index
    %24 = vector.load %arg7[%c0_9, %c0_10] : memref<1x32xf32, #tpu.memory_space<vmem>>, vector<1x32xf32>
    %25 = vector.broadcast %24 : vector<1x32xf32> to vector<10x32xf32>
    %26 = arith.addf %23, %25 : vector<10x32xf32>
    %c0_11 = arith.constant 0 : index
    %c0_12 = arith.constant 0 : index
    %27 = vector.load %arg1[%c0_11, %c0_12] : memref<16x1xf32, #tpu.memory_space<vmem>>, vector<16x1xf32>
    %c0_13 = arith.constant 0 : index
    %c0_14 = arith.constant 0 : index
    %28 = vector.load %arg8[%c0_13, %c0_14] : memref<1x8xf32, #tpu.memory_space<vmem>>, vector<1x8xf32>
    %29 = vector.broadcast %27 : vector<16x1xf32> to vector<16x8xf32>
    %30 = vector.broadcast %28 : vector<1x8xf32> to vector<16x8xf32>
    %31 = arith.mulf %29, %30 : vector<16x8xf32>
    %c0_15 = arith.constant 0 : index
    %c0_16 = arith.constant 0 : index
    %32 = vector.load %arg9[%c0_15, %c0_16] : memref<1x8xf32, #tpu.memory_space<vmem>>, vector<1x8xf32>
    %33 = vector.broadcast %32 : vector<1x8xf32> to vector<16x8xf32>
    %34 = arith.addf %31, %33 : vector<16x8xf32>
    %35 = arith.truncf %26 : vector<10x32xf32> to vector<10x32xbf16>
    %cst_17 = arith.constant dense<0.000000e+00> : vector<32x32xf32>
    %36 = tpu.matmul %6, %35, %cst_17 {dimension_numbers = #tpu.dot_dimension_numbers<[1], [0], [0], [1], [0, 0, 1, 1], [], []>} : vector<32x10xbf16>, vector<10x32xbf16>, vector<32x32xf32> -> vector<32x32xf32>
    %37 = vector.extract_strided_slice %36 {offsets = [0, 0], sizes = [16, 32], strides = [1, 1]} : vector<32x32xf32> to vector<16x32xf32>
    %38 = vector.extract_strided_slice %36 {offsets = [16, 0], sizes = [16, 32], strides = [1, 1]} : vector<32x32xf32> to vector<16x32xf32>
    %39 = tpu.concatenate %37, %38, %34 in 1 : vector<16x32xf32>, vector<16x32xf32>, vector<16x8xf32> -> vector<16x72xf32>
    %c0_18 = arith.constant 0 : index
    %c0_19 = arith.constant 0 : index
    %c0_20 = arith.constant 0 : index
    %40 = vector.load %arg10[%c0_18, %c0_19, %c0_20] : memref<4x72x40xbf16, #tpu.memory_space<vmem>>, vector<1x72x40xbf16>
    %41 = vector.shape_cast %40 : vector<1x72x40xbf16> to vector<72x40xbf16>
    %42 = arith.truncf %39 : vector<16x72xf32> to vector<16x72xbf16>
    %cst_21 = arith.constant dense<0.000000e+00> : vector<16x40xf32>
    %43 = tpu.matmul %42, %41, %cst_21 {dimension_numbers = #tpu.dot_dimension_numbers<[1], [0], [0], [1], [0, 0, 1, 1], [], []>} : vector<16x72xbf16>, vector<72x40xbf16>, vector<16x40xf32> -> vector<16x40xf32>
    %c0_22 = arith.constant 0 : index
    %c0_23 = arith.constant 0 : index
    %c0_24 = arith.constant 0 : index
    %44 = vector.load %arg11[%c0_22, %c0_23, %c0_24] : memref<4x1x40xf32, #tpu.memory_space<vmem>>, vector<1x1x40xf32>
    %45 = vector.shape_cast %44 : vector<1x1x40xf32> to vector<1x40xf32>
    %46 = vector.broadcast %45 : vector<1x40xf32> to vector<16x40xf32>
    %47 = arith.addf %43, %46 : vector<16x40xf32>
    %48 = vector.extract_strided_slice %47 {offsets = [0, 0], sizes = [16, 32], strides = [1, 1]} : vector<16x40xf32> to vector<16x32xf32>
    %c0_25 = arith.constant 0 : index
    %c0_26 = arith.constant 0 : index
    %c0_27 = arith.constant 0 : index
    %49 = vector.load %arg12[%c0_25, %c0_26, %c0_27] : memref<4x1x32xf32, #tpu.memory_space<vmem>>, vector<1x1x32xf32>
    %50 = vector.shape_cast %49 : vector<1x1x32xf32> to vector<1x32xf32>
    %c0_28 = arith.constant 0 : index
    %c0_29 = arith.constant 0 : index
    %c0_30 = arith.constant 0 : index
    %51 = vector.load %arg13[%c0_28, %c0_29, %c0_30] : memref<4x1x32xf32, #tpu.memory_space<vmem>>, vector<1x1x32xf32>
    %52 = vector.shape_cast %51 : vector<1x1x32xf32> to vector<1x32xf32>
    %cst_31 = arith.constant dense<0.000000e+00> : vector<16xf32>
    %53 = vector.multi_reduction <add>, %48, %cst_31 [1] : vector<16x32xf32> to vector<16xf32>
    %54 = vector.shape_cast %53 : vector<16xf32> to vector<16x1xf32>
    %cst_32 = arith.constant 3.200000e+01 : f32
    %55 = vector.broadcast %cst_32 : f32 to vector<16x1xf32>
    %56 = arith.divf %54, %55 : vector<16x1xf32>
    %57 = vector.broadcast %56 : vector<16x1xf32> to vector<16x32xf32>
    %58 = arith.subf %48, %57 : vector<16x32xf32>
    %59 = arith.mulf %58, %58 : vector<16x32xf32>
    %cst_33 = arith.constant dense<0.000000e+00> : vector<16xf32>
    %60 = vector.multi_reduction <add>, %59, %cst_33 [1] : vector<16x32xf32> to vector<16xf32>
    %61 = vector.shape_cast %60 : vector<16xf32> to vector<16x1xf32>
    %cst_34 = arith.constant 3.200000e+01 : f32
    %62 = vector.broadcast %cst_34 : f32 to vector<16x1xf32>
    %63 = arith.divf %61, %62 : vector<16x1xf32>
    %cst_35 = arith.constant 9.99999974E-6 : f32
    %64 = vector.broadcast %cst_35 : f32 to vector<16x1xf32>
    %65 = arith.addf %63, %64 : vector<16x1xf32>
    %66 = math.rsqrt %65 : vector<16x1xf32>
    %67 = vector.broadcast %66 : vector<16x1xf32> to vector<16x32xf32>
    %68 = arith.mulf %58, %67 : vector<16x32xf32>
    %69 = vector.broadcast %50 : vector<1x32xf32> to vector<16x32xf32>
    %70 = arith.mulf %68, %69 : vector<16x32xf32>
    %71 = vector.broadcast %52 : vector<1x32xf32> to vector<16x32xf32>
    %72 = arith.addf %70, %71 : vector<16x32xf32>
    %cst_36 = arith.constant 0.000000e+00 : f32
    %73 = vector.broadcast %cst_36 : f32 to vector<16x32xf32>
    %74 = arith.maximumf %72, %73 : vector<16x32xf32>
    %75 = vector.extract_strided_slice %47 {offsets = [0, 32], sizes = [16, 8], strides = [1, 1]} : vector<16x40xf32> to vector<16x8xf32>
    %c0_37 = arith.constant 0 : index
    %c0_38 = arith.constant 0 : index
    %c0_39 = arith.constant 0 : index
    %76 = vector.load %arg14[%c0_37, %c0_38, %c0_39] : memref<4x1x8xf32, #tpu.memory_space<vmem>>, vector<1x1x8xf32>
    %77 = vector.shape_cast %76 : vector<1x1x8xf32> to vector<1x8xf32>
    %c0_40 = arith.constant 0 : index
    %c0_41 = arith.constant 0 : index
    %c0_42 = arith.constant 0 : index
    %78 = vector.load %arg15[%c0_40, %c0_41, %c0_42] : memref<4x1x8xf32, #tpu.memory_space<vmem>>, vector<1x1x8xf32>
    %79 = vector.shape_cast %78 : vector<1x1x8xf32> to vector<1x8xf32>
    %cst_43 = arith.constant dense<0.000000e+00> : vector<16xf32>
    %80 = vector.multi_reduction <add>, %75, %cst_43 [1] : vector<16x8xf32> to vector<16xf32>
    %81 = vector.shape_cast %80 : vector<16xf32> to vector<16x1xf32>
    %cst_44 = arith.constant 8.000000e+00 : f32
    %82 = vector.broadcast %cst_44 : f32 to vector<16x1xf32>
    %83 = arith.divf %81, %82 : vector<16x1xf32>
    %84 = vector.broadcast %83 : vector<16x1xf32> to vector<16x8xf32>
    %85 = arith.subf %75, %84 : vector<16x8xf32>
    %86 = arith.mulf %85, %85 : vector<16x8xf32>
    %cst_45 = arith.constant dense<0.000000e+00> : vector<16xf32>
    %87 = vector.multi_reduction <add>, %86, %cst_45 [1] : vector<16x8xf32> to vector<16xf32>
    %88 = vector.shape_cast %87 : vector<16xf32> to vector<16x1xf32>
    %cst_46 = arith.constant 8.000000e+00 : f32
    %89 = vector.broadcast %cst_46 : f32 to vector<16x1xf32>
    %90 = arith.divf %88, %89 : vector<16x1xf32>
    %cst_47 = arith.constant 9.99999974E-6 : f32
    %91 = vector.broadcast %cst_47 : f32 to vector<16x1xf32>
    %92 = arith.addf %90, %91 : vector<16x1xf32>
    %93 = math.rsqrt %92 : vector<16x1xf32>
    %94 = vector.broadcast %93 : vector<16x1xf32> to vector<16x8xf32>
    %95 = arith.mulf %85, %94 : vector<16x8xf32>
    %96 = vector.broadcast %77 : vector<1x8xf32> to vector<16x8xf32>
    %97 = arith.mulf %95, %96 : vector<16x8xf32>
    %98 = vector.broadcast %79 : vector<1x8xf32> to vector<16x8xf32>
    %99 = arith.addf %97, %98 : vector<16x8xf32>
    %cst_48 = arith.constant 0.000000e+00 : f32
    %100 = vector.broadcast %cst_48 : f32 to vector<16x8xf32>
    %101 = arith.maximumf %99, %100 : vector<16x8xf32>
    %102 = tpu.concatenate %74, %101 in 1 : vector<16x32xf32>, vector<16x8xf32> -> vector<16x40xf32>
    %c0_49 = arith.constant 0 : index
    %c0_50 = arith.constant 0 : index
    %c0_51 = arith.constant 0 : index
    %103 = vector.load %arg16[%c0_49, %c0_50, %c0_51] : memref<4x40x40xbf16, #tpu.memory_space<vmem>>, vector<1x40x40xbf16>
    %104 = vector.shape_cast %103 : vector<1x40x40xbf16> to vector<40x40xbf16>
    %105 = arith.truncf %102 : vector<16x40xf32> to vector<16x40xbf16>
    %cst_52 = arith.constant dense<0.000000e+00> : vector<16x40xf32>
    %106 = tpu.matmul %105, %104, %cst_52 {dimension_numbers = #tpu.dot_dimension_numbers<[1], [0], [0], [1], [0, 0, 1, 1], [], []>} : vector<16x40xbf16>, vector<40x40xbf16>, vector<16x40xf32> -> vector<16x40xf32>
    %c0_53 = arith.constant 0 : index
    %c0_54 = arith.constant 0 : index
    %c0_55 = arith.constant 0 : index
    %107 = vector.load %arg17[%c0_53, %c0_54, %c0_55] : memref<4x1x40xf32, #tpu.memory_space<vmem>>, vector<1x1x40xf32>
    %108 = vector.shape_cast %107 : vector<1x1x40xf32> to vector<1x40xf32>
    %109 = vector.broadcast %108 : vector<1x40xf32> to vector<16x40xf32>
    %110 = arith.addf %106, %109 : vector<16x40xf32>
    %111 = vector.extract_strided_slice %110 {offsets = [0, 0], sizes = [16, 32], strides = [1, 1]} : vector<16x40xf32> to vector<16x32xf32>
    %112 = arith.truncf %111 : vector<16x32xf32> to vector<16x32xbf16>
    %cst_56 = arith.constant dense<0.000000e+00> : vector<10x32xf32>
    %113 = tpu.matmul %13, %112, %cst_56 {dimension_numbers = #tpu.dot_dimension_numbers<[1], [0], [0], [1], [0, 0, 1, 1], [], []>} : vector<10x16xbf16>, vector<16x32xbf16>, vector<10x32xf32> -> vector<10x32xf32>
    %cst_57 = arith.constant 2.000000e+00 : f32
    %114 = vector.broadcast %cst_57 : f32 to vector<10x32xf32>
    %115 = arith.mulf %114, %26 : vector<10x32xf32>
    %116 = arith.addf %115, %113 : vector<10x32xf32>
    %cst_58 = arith.constant 2.000000e+00 : f32
    %117 = vector.broadcast %cst_58 : f32 to vector<16x8xf32>
    %118 = arith.mulf %117, %34 : vector<16x8xf32>
    %119 = vector.extract_strided_slice %110 {offsets = [0, 32], sizes = [16, 8], strides = [1, 1]} : vector<16x40xf32> to vector<16x8xf32>
    %120 = arith.addf %118, %119 : vector<16x8xf32>
    %121 = arith.truncf %116 : vector<10x32xf32> to vector<10x32xbf16>
    %cst_59 = arith.constant dense<0.000000e+00> : vector<32x32xf32>
    %122 = tpu.matmul %6, %121, %cst_59 {dimension_numbers = #tpu.dot_dimension_numbers<[1], [0], [0], [1], [0, 0, 1, 1], [], []>} : vector<32x10xbf16>, vector<10x32xbf16>, vector<32x32xf32> -> vector<32x32xf32>
    %123 = vector.extract_strided_slice %122 {offsets = [0, 0], sizes = [16, 32], strides = [1, 1]} : vector<32x32xf32> to vector<16x32xf32>
    %124 = vector.extract_strided_slice %122 {offsets = [16, 0], sizes = [16, 32], strides = [1, 1]} : vector<32x32xf32> to vector<16x32xf32>
    %125 = tpu.concatenate %123, %124, %120 in 1 : vector<16x32xf32>, vector<16x32xf32>, vector<16x8xf32> -> vector<16x72xf32>
    %c1 = arith.constant 1 : index
    %c0_60 = arith.constant 0 : index
    %c0_61 = arith.constant 0 : index
    %126 = vector.load %arg10[%c1, %c0_60, %c0_61] : memref<4x72x40xbf16, #tpu.memory_space<vmem>>, vector<1x72x40xbf16>
    %127 = vector.shape_cast %126 : vector<1x72x40xbf16> to vector<72x40xbf16>
    %128 = arith.truncf %125 : vector<16x72xf32> to vector<16x72xbf16>
    %cst_62 = arith.constant dense<0.000000e+00> : vector<16x40xf32>
    %129 = tpu.matmul %128, %127, %cst_62 {dimension_numbers = #tpu.dot_dimension_numbers<[1], [0], [0], [1], [0, 0, 1, 1], [], []>} : vector<16x72xbf16>, vector<72x40xbf16>, vector<16x40xf32> -> vector<16x40xf32>
    %c1_63 = arith.constant 1 : index
    %c0_64 = arith.constant 0 : index
    %c0_65 = arith.constant 0 : index
    %130 = vector.load %arg11[%c1_63, %c0_64, %c0_65] : memref<4x1x40xf32, #tpu.memory_space<vmem>>, vector<1x1x40xf32>
    %131 = vector.shape_cast %130 : vector<1x1x40xf32> to vector<1x40xf32>
    %132 = vector.broadcast %131 : vector<1x40xf32> to vector<16x40xf32>
    %133 = arith.addf %129, %132 : vector<16x40xf32>
    %134 = vector.extract_strided_slice %133 {offsets = [0, 0], sizes = [16, 32], strides = [1, 1]} : vector<16x40xf32> to vector<16x32xf32>
    %c1_66 = arith.constant 1 : index
    %c0_67 = arith.constant 0 : index
    %c0_68 = arith.constant 0 : index
    %135 = vector.load %arg12[%c1_66, %c0_67, %c0_68] : memref<4x1x32xf32, #tpu.memory_space<vmem>>, vector<1x1x32xf32>
    %136 = vector.shape_cast %135 : vector<1x1x32xf32> to vector<1x32xf32>
    %c1_69 = arith.constant 1 : index
    %c0_70 = arith.constant 0 : index
    %c0_71 = arith.constant 0 : index
    %137 = vector.load %arg13[%c1_69, %c0_70, %c0_71] : memref<4x1x32xf32, #tpu.memory_space<vmem>>, vector<1x1x32xf32>
    %138 = vector.shape_cast %137 : vector<1x1x32xf32> to vector<1x32xf32>
    %cst_72 = arith.constant dense<0.000000e+00> : vector<16xf32>
    %139 = vector.multi_reduction <add>, %134, %cst_72 [1] : vector<16x32xf32> to vector<16xf32>
    %140 = vector.shape_cast %139 : vector<16xf32> to vector<16x1xf32>
    %cst_73 = arith.constant 3.200000e+01 : f32
    %141 = vector.broadcast %cst_73 : f32 to vector<16x1xf32>
    %142 = arith.divf %140, %141 : vector<16x1xf32>
    %143 = vector.broadcast %142 : vector<16x1xf32> to vector<16x32xf32>
    %144 = arith.subf %134, %143 : vector<16x32xf32>
    %145 = arith.mulf %144, %144 : vector<16x32xf32>
    %cst_74 = arith.constant dense<0.000000e+00> : vector<16xf32>
    %146 = vector.multi_reduction <add>, %145, %cst_74 [1] : vector<16x32xf32> to vector<16xf32>
    %147 = vector.shape_cast %146 : vector<16xf32> to vector<16x1xf32>
    %cst_75 = arith.constant 3.200000e+01 : f32
    %148 = vector.broadcast %cst_75 : f32 to vector<16x1xf32>
    %149 = arith.divf %147, %148 : vector<16x1xf32>
    %cst_76 = arith.constant 9.99999974E-6 : f32
    %150 = vector.broadcast %cst_76 : f32 to vector<16x1xf32>
    %151 = arith.addf %149, %150 : vector<16x1xf32>
    %152 = math.rsqrt %151 : vector<16x1xf32>
    %153 = vector.broadcast %152 : vector<16x1xf32> to vector<16x32xf32>
    %154 = arith.mulf %144, %153 : vector<16x32xf32>
    %155 = vector.broadcast %136 : vector<1x32xf32> to vector<16x32xf32>
    %156 = arith.mulf %154, %155 : vector<16x32xf32>
    %157 = vector.broadcast %138 : vector<1x32xf32> to vector<16x32xf32>
    %158 = arith.addf %156, %157 : vector<16x32xf32>
    %cst_77 = arith.constant 0.000000e+00 : f32
    %159 = vector.broadcast %cst_77 : f32 to vector<16x32xf32>
    %160 = arith.maximumf %158, %159 : vector<16x32xf32>
    %161 = vector.extract_strided_slice %133 {offsets = [0, 32], sizes = [16, 8], strides = [1, 1]} : vector<16x40xf32> to vector<16x8xf32>
    %c1_78 = arith.constant 1 : index
    %c0_79 = arith.constant 0 : index
    %c0_80 = arith.constant 0 : index
    %162 = vector.load %arg14[%c1_78, %c0_79, %c0_80] : memref<4x1x8xf32, #tpu.memory_space<vmem>>, vector<1x1x8xf32>
    %163 = vector.shape_cast %162 : vector<1x1x8xf32> to vector<1x8xf32>
    %c1_81 = arith.constant 1 : index
    %c0_82 = arith.constant 0 : index
    %c0_83 = arith.constant 0 : index
    %164 = vector.load %arg15[%c1_81, %c0_82, %c0_83] : memref<4x1x8xf32, #tpu.memory_space<vmem>>, vector<1x1x8xf32>
    %165 = vector.shape_cast %164 : vector<1x1x8xf32> to vector<1x8xf32>
    %cst_84 = arith.constant dense<0.000000e+00> : vector<16xf32>
    %166 = vector.multi_reduction <add>, %161, %cst_84 [1] : vector<16x8xf32> to vector<16xf32>
    %167 = vector.shape_cast %166 : vector<16xf32> to vector<16x1xf32>
    %cst_85 = arith.constant 8.000000e+00 : f32
    %168 = vector.broadcast %cst_85 : f32 to vector<16x1xf32>
    %169 = arith.divf %167, %168 : vector<16x1xf32>
    %170 = vector.broadcast %169 : vector<16x1xf32> to vector<16x8xf32>
    %171 = arith.subf %161, %170 : vector<16x8xf32>
    %172 = arith.mulf %171, %171 : vector<16x8xf32>
    %cst_86 = arith.constant dense<0.000000e+00> : vector<16xf32>
    %173 = vector.multi_reduction <add>, %172, %cst_86 [1] : vector<16x8xf32> to vector<16xf32>
    %174 = vector.shape_cast %173 : vector<16xf32> to vector<16x1xf32>
    %cst_87 = arith.constant 8.000000e+00 : f32
    %175 = vector.broadcast %cst_87 : f32 to vector<16x1xf32>
    %176 = arith.divf %174, %175 : vector<16x1xf32>
    %cst_88 = arith.constant 9.99999974E-6 : f32
    %177 = vector.broadcast %cst_88 : f32 to vector<16x1xf32>
    %178 = arith.addf %176, %177 : vector<16x1xf32>
    %179 = math.rsqrt %178 : vector<16x1xf32>
    %180 = vector.broadcast %179 : vector<16x1xf32> to vector<16x8xf32>
    %181 = arith.mulf %171, %180 : vector<16x8xf32>
    %182 = vector.broadcast %163 : vector<1x8xf32> to vector<16x8xf32>
    %183 = arith.mulf %181, %182 : vector<16x8xf32>
    %184 = vector.broadcast %165 : vector<1x8xf32> to vector<16x8xf32>
    %185 = arith.addf %183, %184 : vector<16x8xf32>
    %cst_89 = arith.constant 0.000000e+00 : f32
    %186 = vector.broadcast %cst_89 : f32 to vector<16x8xf32>
    %187 = arith.maximumf %185, %186 : vector<16x8xf32>
    %188 = tpu.concatenate %160, %187 in 1 : vector<16x32xf32>, vector<16x8xf32> -> vector<16x40xf32>
    %c1_90 = arith.constant 1 : index
    %c0_91 = arith.constant 0 : index
    %c0_92 = arith.constant 0 : index
    %189 = vector.load %arg16[%c1_90, %c0_91, %c0_92] : memref<4x40x40xbf16, #tpu.memory_space<vmem>>, vector<1x40x40xbf16>
    %190 = vector.shape_cast %189 : vector<1x40x40xbf16> to vector<40x40xbf16>
    %191 = arith.truncf %188 : vector<16x40xf32> to vector<16x40xbf16>
    %cst_93 = arith.constant dense<0.000000e+00> : vector<16x40xf32>
    %192 = tpu.matmul %191, %190, %cst_93 {dimension_numbers = #tpu.dot_dimension_numbers<[1], [0], [0], [1], [0, 0, 1, 1], [], []>} : vector<16x40xbf16>, vector<40x40xbf16>, vector<16x40xf32> -> vector<16x40xf32>
    %c1_94 = arith.constant 1 : index
    %c0_95 = arith.constant 0 : index
    %c0_96 = arith.constant 0 : index
    %193 = vector.load %arg17[%c1_94, %c0_95, %c0_96] : memref<4x1x40xf32, #tpu.memory_space<vmem>>, vector<1x1x40xf32>
    %194 = vector.shape_cast %193 : vector<1x1x40xf32> to vector<1x40xf32>
    %195 = vector.broadcast %194 : vector<1x40xf32> to vector<16x40xf32>
    %196 = arith.addf %192, %195 : vector<16x40xf32>
    %197 = vector.extract_strided_slice %196 {offsets = [0, 0], sizes = [16, 32], strides = [1, 1]} : vector<16x40xf32> to vector<16x32xf32>
    %198 = arith.truncf %197 : vector<16x32xf32> to vector<16x32xbf16>
    %cst_97 = arith.constant dense<0.000000e+00> : vector<10x32xf32>
    %199 = tpu.matmul %13, %198, %cst_97 {dimension_numbers = #tpu.dot_dimension_numbers<[1], [0], [0], [1], [0, 0, 1, 1], [], []>} : vector<10x16xbf16>, vector<16x32xbf16>, vector<10x32xf32> -> vector<10x32xf32>
    %cst_98 = arith.constant 2.000000e+00 : f32
    %200 = vector.broadcast %cst_98 : f32 to vector<10x32xf32>
    %201 = arith.mulf %200, %116 : vector<10x32xf32>
    %202 = arith.addf %201, %199 : vector<10x32xf32>
    %cst_99 = arith.constant 2.000000e+00 : f32
    %203 = vector.broadcast %cst_99 : f32 to vector<16x8xf32>
    %204 = arith.mulf %203, %120 : vector<16x8xf32>
    %205 = vector.extract_strided_slice %196 {offsets = [0, 32], sizes = [16, 8], strides = [1, 1]} : vector<16x40xf32> to vector<16x8xf32>
    %206 = arith.addf %204, %205 : vector<16x8xf32>
    %207 = arith.truncf %202 : vector<10x32xf32> to vector<10x32xbf16>
    %cst_100 = arith.constant dense<0.000000e+00> : vector<32x32xf32>
    %208 = tpu.matmul %6, %207, %cst_100 {dimension_numbers = #tpu.dot_dimension_numbers<[1], [0], [0], [1], [0, 0, 1, 1], [], []>} : vector<32x10xbf16>, vector<10x32xbf16>, vector<32x32xf32> -> vector<32x32xf32>
    %209 = vector.extract_strided_slice %208 {offsets = [0, 0], sizes = [16, 32], strides = [1, 1]} : vector<32x32xf32> to vector<16x32xf32>
    %210 = vector.extract_strided_slice %208 {offsets = [16, 0], sizes = [16, 32], strides = [1, 1]} : vector<32x32xf32> to vector<16x32xf32>
    %211 = tpu.concatenate %209, %210, %206 in 1 : vector<16x32xf32>, vector<16x32xf32>, vector<16x8xf32> -> vector<16x72xf32>
    %c2 = arith.constant 2 : index
    %c0_101 = arith.constant 0 : index
    %c0_102 = arith.constant 0 : index
    %212 = vector.load %arg10[%c2, %c0_101, %c0_102] : memref<4x72x40xbf16, #tpu.memory_space<vmem>>, vector<1x72x40xbf16>
    %213 = vector.shape_cast %212 : vector<1x72x40xbf16> to vector<72x40xbf16>
    %214 = arith.truncf %211 : vector<16x72xf32> to vector<16x72xbf16>
    %cst_103 = arith.constant dense<0.000000e+00> : vector<16x40xf32>
    %215 = tpu.matmul %214, %213, %cst_103 {dimension_numbers = #tpu.dot_dimension_numbers<[1], [0], [0], [1], [0, 0, 1, 1], [], []>} : vector<16x72xbf16>, vector<72x40xbf16>, vector<16x40xf32> -> vector<16x40xf32>
    %c2_104 = arith.constant 2 : index
    %c0_105 = arith.constant 0 : index
    %c0_106 = arith.constant 0 : index
    %216 = vector.load %arg11[%c2_104, %c0_105, %c0_106] : memref<4x1x40xf32, #tpu.memory_space<vmem>>, vector<1x1x40xf32>
    %217 = vector.shape_cast %216 : vector<1x1x40xf32> to vector<1x40xf32>
    %218 = vector.broadcast %217 : vector<1x40xf32> to vector<16x40xf32>
    %219 = arith.addf %215, %218 : vector<16x40xf32>
    %220 = vector.extract_strided_slice %219 {offsets = [0, 0], sizes = [16, 32], strides = [1, 1]} : vector<16x40xf32> to vector<16x32xf32>
    %c2_107 = arith.constant 2 : index
    %c0_108 = arith.constant 0 : index
    %c0_109 = arith.constant 0 : index
    %221 = vector.load %arg12[%c2_107, %c0_108, %c0_109] : memref<4x1x32xf32, #tpu.memory_space<vmem>>, vector<1x1x32xf32>
    %222 = vector.shape_cast %221 : vector<1x1x32xf32> to vector<1x32xf32>
    %c2_110 = arith.constant 2 : index
    %c0_111 = arith.constant 0 : index
    %c0_112 = arith.constant 0 : index
    %223 = vector.load %arg13[%c2_110, %c0_111, %c0_112] : memref<4x1x32xf32, #tpu.memory_space<vmem>>, vector<1x1x32xf32>
    %224 = vector.shape_cast %223 : vector<1x1x32xf32> to vector<1x32xf32>
    %cst_113 = arith.constant dense<0.000000e+00> : vector<16xf32>
    %225 = vector.multi_reduction <add>, %220, %cst_113 [1] : vector<16x32xf32> to vector<16xf32>
    %226 = vector.shape_cast %225 : vector<16xf32> to vector<16x1xf32>
    %cst_114 = arith.constant 3.200000e+01 : f32
    %227 = vector.broadcast %cst_114 : f32 to vector<16x1xf32>
    %228 = arith.divf %226, %227 : vector<16x1xf32>
    %229 = vector.broadcast %228 : vector<16x1xf32> to vector<16x32xf32>
    %230 = arith.subf %220, %229 : vector<16x32xf32>
    %231 = arith.mulf %230, %230 : vector<16x32xf32>
    %cst_115 = arith.constant dense<0.000000e+00> : vector<16xf32>
    %232 = vector.multi_reduction <add>, %231, %cst_115 [1] : vector<16x32xf32> to vector<16xf32>
    %233 = vector.shape_cast %232 : vector<16xf32> to vector<16x1xf32>
    %cst_116 = arith.constant 3.200000e+01 : f32
    %234 = vector.broadcast %cst_116 : f32 to vector<16x1xf32>
    %235 = arith.divf %233, %234 : vector<16x1xf32>
    %cst_117 = arith.constant 9.99999974E-6 : f32
    %236 = vector.broadcast %cst_117 : f32 to vector<16x1xf32>
    %237 = arith.addf %235, %236 : vector<16x1xf32>
    %238 = math.rsqrt %237 : vector<16x1xf32>
    %239 = vector.broadcast %238 : vector<16x1xf32> to vector<16x32xf32>
    %240 = arith.mulf %230, %239 : vector<16x32xf32>
    %241 = vector.broadcast %222 : vector<1x32xf32> to vector<16x32xf32>
    %242 = arith.mulf %240, %241 : vector<16x32xf32>
    %243 = vector.broadcast %224 : vector<1x32xf32> to vector<16x32xf32>
    %244 = arith.addf %242, %243 : vector<16x32xf32>
    %cst_118 = arith.constant 0.000000e+00 : f32
    %245 = vector.broadcast %cst_118 : f32 to vector<16x32xf32>
    %246 = arith.maximumf %244, %245 : vector<16x32xf32>
    %247 = vector.extract_strided_slice %219 {offsets = [0, 32], sizes = [16, 8], strides = [1, 1]} : vector<16x40xf32> to vector<16x8xf32>
    %c2_119 = arith.constant 2 : index
    %c0_120 = arith.constant 0 : index
    %c0_121 = arith.constant 0 : index
    %248 = vector.load %arg14[%c2_119, %c0_120, %c0_121] : memref<4x1x8xf32, #tpu.memory_space<vmem>>, vector<1x1x8xf32>
    %249 = vector.shape_cast %248 : vector<1x1x8xf32> to vector<1x8xf32>
    %c2_122 = arith.constant 2 : index
    %c0_123 = arith.constant 0 : index
    %c0_124 = arith.constant 0 : index
    %250 = vector.load %arg15[%c2_122, %c0_123, %c0_124] : memref<4x1x8xf32, #tpu.memory_space<vmem>>, vector<1x1x8xf32>
    %251 = vector.shape_cast %250 : vector<1x1x8xf32> to vector<1x8xf32>
    %cst_125 = arith.constant dense<0.000000e+00> : vector<16xf32>
    %252 = vector.multi_reduction <add>, %247, %cst_125 [1] : vector<16x8xf32> to vector<16xf32>
    %253 = vector.shape_cast %252 : vector<16xf32> to vector<16x1xf32>
    %cst_126 = arith.constant 8.000000e+00 : f32
    %254 = vector.broadcast %cst_126 : f32 to vector<16x1xf32>
    %255 = arith.divf %253, %254 : vector<16x1xf32>
    %256 = vector.broadcast %255 : vector<16x1xf32> to vector<16x8xf32>
    %257 = arith.subf %247, %256 : vector<16x8xf32>
    %258 = arith.mulf %257, %257 : vector<16x8xf32>
    %cst_127 = arith.constant dense<0.000000e+00> : vector<16xf32>
    %259 = vector.multi_reduction <add>, %258, %cst_127 [1] : vector<16x8xf32> to vector<16xf32>
    %260 = vector.shape_cast %259 : vector<16xf32> to vector<16x1xf32>
    %cst_128 = arith.constant 8.000000e+00 : f32
    %261 = vector.broadcast %cst_128 : f32 to vector<16x1xf32>
    %262 = arith.divf %260, %261 : vector<16x1xf32>
    %cst_129 = arith.constant 9.99999974E-6 : f32
    %263 = vector.broadcast %cst_129 : f32 to vector<16x1xf32>
    %264 = arith.addf %262, %263 : vector<16x1xf32>
    %265 = math.rsqrt %264 : vector<16x1xf32>
    %266 = vector.broadcast %265 : vector<16x1xf32> to vector<16x8xf32>
    %267 = arith.mulf %257, %266 : vector<16x8xf32>
    %268 = vector.broadcast %249 : vector<1x8xf32> to vector<16x8xf32>
    %269 = arith.mulf %267, %268 : vector<16x8xf32>
    %270 = vector.broadcast %251 : vector<1x8xf32> to vector<16x8xf32>
    %271 = arith.addf %269, %270 : vector<16x8xf32>
    %cst_130 = arith.constant 0.000000e+00 : f32
    %272 = vector.broadcast %cst_130 : f32 to vector<16x8xf32>
    %273 = arith.maximumf %271, %272 : vector<16x8xf32>
    %274 = tpu.concatenate %246, %273 in 1 : vector<16x32xf32>, vector<16x8xf32> -> vector<16x40xf32>
    %c2_131 = arith.constant 2 : index
    %c0_132 = arith.constant 0 : index
    %c0_133 = arith.constant 0 : index
    %275 = vector.load %arg16[%c2_131, %c0_132, %c0_133] : memref<4x40x40xbf16, #tpu.memory_space<vmem>>, vector<1x40x40xbf16>
    %276 = vector.shape_cast %275 : vector<1x40x40xbf16> to vector<40x40xbf16>
    %277 = arith.truncf %274 : vector<16x40xf32> to vector<16x40xbf16>
    %cst_134 = arith.constant dense<0.000000e+00> : vector<16x40xf32>
    %278 = tpu.matmul %277, %276, %cst_134 {dimension_numbers = #tpu.dot_dimension_numbers<[1], [0], [0], [1], [0, 0, 1, 1], [], []>} : vector<16x40xbf16>, vector<40x40xbf16>, vector<16x40xf32> -> vector<16x40xf32>
    %c2_135 = arith.constant 2 : index
    %c0_136 = arith.constant 0 : index
    %c0_137 = arith.constant 0 : index
    %279 = vector.load %arg17[%c2_135, %c0_136, %c0_137] : memref<4x1x40xf32, #tpu.memory_space<vmem>>, vector<1x1x40xf32>
    %280 = vector.shape_cast %279 : vector<1x1x40xf32> to vector<1x40xf32>
    %281 = vector.broadcast %280 : vector<1x40xf32> to vector<16x40xf32>
    %282 = arith.addf %278, %281 : vector<16x40xf32>
    %283 = vector.extract_strided_slice %282 {offsets = [0, 0], sizes = [16, 32], strides = [1, 1]} : vector<16x40xf32> to vector<16x32xf32>
    %284 = arith.truncf %283 : vector<16x32xf32> to vector<16x32xbf16>
    %cst_138 = arith.constant dense<0.000000e+00> : vector<10x32xf32>
    %285 = tpu.matmul %13, %284, %cst_138 {dimension_numbers = #tpu.dot_dimension_numbers<[1], [0], [0], [1], [0, 0, 1, 1], [], []>} : vector<10x16xbf16>, vector<16x32xbf16>, vector<10x32xf32> -> vector<10x32xf32>
    %cst_139 = arith.constant 2.000000e+00 : f32
    %286 = vector.broadcast %cst_139 : f32 to vector<10x32xf32>
    %287 = arith.mulf %286, %202 : vector<10x32xf32>
    %288 = arith.addf %287, %285 : vector<10x32xf32>
    %cst_140 = arith.constant 2.000000e+00 : f32
    %289 = vector.broadcast %cst_140 : f32 to vector<16x8xf32>
    %290 = arith.mulf %289, %206 : vector<16x8xf32>
    %291 = vector.extract_strided_slice %282 {offsets = [0, 32], sizes = [16, 8], strides = [1, 1]} : vector<16x40xf32> to vector<16x8xf32>
    %292 = arith.addf %290, %291 : vector<16x8xf32>
    %293 = arith.truncf %288 : vector<10x32xf32> to vector<10x32xbf16>
    %cst_141 = arith.constant dense<0.000000e+00> : vector<32x32xf32>
    %294 = tpu.matmul %6, %293, %cst_141 {dimension_numbers = #tpu.dot_dimension_numbers<[1], [0], [0], [1], [0, 0, 1, 1], [], []>} : vector<32x10xbf16>, vector<10x32xbf16>, vector<32x32xf32> -> vector<32x32xf32>
    %295 = vector.extract_strided_slice %294 {offsets = [0, 0], sizes = [16, 32], strides = [1, 1]} : vector<32x32xf32> to vector<16x32xf32>
    %296 = vector.extract_strided_slice %294 {offsets = [16, 0], sizes = [16, 32], strides = [1, 1]} : vector<32x32xf32> to vector<16x32xf32>
    %297 = tpu.concatenate %295, %296, %292 in 1 : vector<16x32xf32>, vector<16x32xf32>, vector<16x8xf32> -> vector<16x72xf32>
    %c3 = arith.constant 3 : index
    %c0_142 = arith.constant 0 : index
    %c0_143 = arith.constant 0 : index
    %298 = vector.load %arg10[%c3, %c0_142, %c0_143] : memref<4x72x40xbf16, #tpu.memory_space<vmem>>, vector<1x72x40xbf16>
    %299 = vector.shape_cast %298 : vector<1x72x40xbf16> to vector<72x40xbf16>
    %300 = arith.truncf %297 : vector<16x72xf32> to vector<16x72xbf16>
    %cst_144 = arith.constant dense<0.000000e+00> : vector<16x40xf32>
    %301 = tpu.matmul %300, %299, %cst_144 {dimension_numbers = #tpu.dot_dimension_numbers<[1], [0], [0], [1], [0, 0, 1, 1], [], []>} : vector<16x72xbf16>, vector<72x40xbf16>, vector<16x40xf32> -> vector<16x40xf32>
    %c3_145 = arith.constant 3 : index
    %c0_146 = arith.constant 0 : index
    %c0_147 = arith.constant 0 : index
    %302 = vector.load %arg11[%c3_145, %c0_146, %c0_147] : memref<4x1x40xf32, #tpu.memory_space<vmem>>, vector<1x1x40xf32>
    %303 = vector.shape_cast %302 : vector<1x1x40xf32> to vector<1x40xf32>
    %304 = vector.broadcast %303 : vector<1x40xf32> to vector<16x40xf32>
    %305 = arith.addf %301, %304 : vector<16x40xf32>
    %306 = vector.extract_strided_slice %305 {offsets = [0, 0], sizes = [16, 32], strides = [1, 1]} : vector<16x40xf32> to vector<16x32xf32>
    %c3_148 = arith.constant 3 : index
    %c0_149 = arith.constant 0 : index
    %c0_150 = arith.constant 0 : index
    %307 = vector.load %arg12[%c3_148, %c0_149, %c0_150] : memref<4x1x32xf32, #tpu.memory_space<vmem>>, vector<1x1x32xf32>
    %308 = vector.shape_cast %307 : vector<1x1x32xf32> to vector<1x32xf32>
    %c3_151 = arith.constant 3 : index
    %c0_152 = arith.constant 0 : index
    %c0_153 = arith.constant 0 : index
    %309 = vector.load %arg13[%c3_151, %c0_152, %c0_153] : memref<4x1x32xf32, #tpu.memory_space<vmem>>, vector<1x1x32xf32>
    %310 = vector.shape_cast %309 : vector<1x1x32xf32> to vector<1x32xf32>
    %cst_154 = arith.constant dense<0.000000e+00> : vector<16xf32>
    %311 = vector.multi_reduction <add>, %306, %cst_154 [1] : vector<16x32xf32> to vector<16xf32>
    %312 = vector.shape_cast %311 : vector<16xf32> to vector<16x1xf32>
    %cst_155 = arith.constant 3.200000e+01 : f32
    %313 = vector.broadcast %cst_155 : f32 to vector<16x1xf32>
    %314 = arith.divf %312, %313 : vector<16x1xf32>
    %315 = vector.broadcast %314 : vector<16x1xf32> to vector<16x32xf32>
    %316 = arith.subf %306, %315 : vector<16x32xf32>
    %317 = arith.mulf %316, %316 : vector<16x32xf32>
    %cst_156 = arith.constant dense<0.000000e+00> : vector<16xf32>
    %318 = vector.multi_reduction <add>, %317, %cst_156 [1] : vector<16x32xf32> to vector<16xf32>
    %319 = vector.shape_cast %318 : vector<16xf32> to vector<16x1xf32>
    %cst_157 = arith.constant 3.200000e+01 : f32
    %320 = vector.broadcast %cst_157 : f32 to vector<16x1xf32>
    %321 = arith.divf %319, %320 : vector<16x1xf32>
    %cst_158 = arith.constant 9.99999974E-6 : f32
    %322 = vector.broadcast %cst_158 : f32 to vector<16x1xf32>
    %323 = arith.addf %321, %322 : vector<16x1xf32>
    %324 = math.rsqrt %323 : vector<16x1xf32>
    %325 = vector.broadcast %324 : vector<16x1xf32> to vector<16x32xf32>
    %326 = arith.mulf %316, %325 : vector<16x32xf32>
    %327 = vector.broadcast %308 : vector<1x32xf32> to vector<16x32xf32>
    %328 = arith.mulf %326, %327 : vector<16x32xf32>
    %329 = vector.broadcast %310 : vector<1x32xf32> to vector<16x32xf32>
    %330 = arith.addf %328, %329 : vector<16x32xf32>
    %cst_159 = arith.constant 0.000000e+00 : f32
    %331 = vector.broadcast %cst_159 : f32 to vector<16x32xf32>
    %332 = arith.maximumf %330, %331 : vector<16x32xf32>
    %333 = vector.extract_strided_slice %305 {offsets = [0, 32], sizes = [16, 8], strides = [1, 1]} : vector<16x40xf32> to vector<16x8xf32>
    %c3_160 = arith.constant 3 : index
    %c0_161 = arith.constant 0 : index
    %c0_162 = arith.constant 0 : index
    %334 = vector.load %arg14[%c3_160, %c0_161, %c0_162] : memref<4x1x8xf32, #tpu.memory_space<vmem>>, vector<1x1x8xf32>
    %335 = vector.shape_cast %334 : vector<1x1x8xf32> to vector<1x8xf32>
    %c3_163 = arith.constant 3 : index
    %c0_164 = arith.constant 0 : index
    %c0_165 = arith.constant 0 : index
    %336 = vector.load %arg15[%c3_163, %c0_164, %c0_165] : memref<4x1x8xf32, #tpu.memory_space<vmem>>, vector<1x1x8xf32>
    %337 = vector.shape_cast %336 : vector<1x1x8xf32> to vector<1x8xf32>
    %cst_166 = arith.constant dense<0.000000e+00> : vector<16xf32>
    %338 = vector.multi_reduction <add>, %333, %cst_166 [1] : vector<16x8xf32> to vector<16xf32>
    %339 = vector.shape_cast %338 : vector<16xf32> to vector<16x1xf32>
    %cst_167 = arith.constant 8.000000e+00 : f32
    %340 = vector.broadcast %cst_167 : f32 to vector<16x1xf32>
    %341 = arith.divf %339, %340 : vector<16x1xf32>
    %342 = vector.broadcast %341 : vector<16x1xf32> to vector<16x8xf32>
    %343 = arith.subf %333, %342 : vector<16x8xf32>
    %344 = arith.mulf %343, %343 : vector<16x8xf32>
    %cst_168 = arith.constant dense<0.000000e+00> : vector<16xf32>
    %345 = vector.multi_reduction <add>, %344, %cst_168 [1] : vector<16x8xf32> to vector<16xf32>
    %346 = vector.shape_cast %345 : vector<16xf32> to vector<16x1xf32>
    %cst_169 = arith.constant 8.000000e+00 : f32
    %347 = vector.broadcast %cst_169 : f32 to vector<16x1xf32>
    %348 = arith.divf %346, %347 : vector<16x1xf32>
    %cst_170 = arith.constant 9.99999974E-6 : f32
    %349 = vector.broadcast %cst_170 : f32 to vector<16x1xf32>
    %350 = arith.addf %348, %349 : vector<16x1xf32>
    %351 = math.rsqrt %350 : vector<16x1xf32>
    %352 = vector.broadcast %351 : vector<16x1xf32> to vector<16x8xf32>
    %353 = arith.mulf %343, %352 : vector<16x8xf32>
    %354 = vector.broadcast %335 : vector<1x8xf32> to vector<16x8xf32>
    %355 = arith.mulf %353, %354 : vector<16x8xf32>
    %356 = vector.broadcast %337 : vector<1x8xf32> to vector<16x8xf32>
    %357 = arith.addf %355, %356 : vector<16x8xf32>
    %cst_171 = arith.constant 0.000000e+00 : f32
    %358 = vector.broadcast %cst_171 : f32 to vector<16x8xf32>
    %359 = arith.maximumf %357, %358 : vector<16x8xf32>
    %360 = tpu.concatenate %332, %359 in 1 : vector<16x32xf32>, vector<16x8xf32> -> vector<16x40xf32>
    %c3_172 = arith.constant 3 : index
    %c0_173 = arith.constant 0 : index
    %c0_174 = arith.constant 0 : index
    %361 = vector.load %arg16[%c3_172, %c0_173, %c0_174] : memref<4x40x40xbf16, #tpu.memory_space<vmem>>, vector<1x40x40xbf16>
    %362 = vector.shape_cast %361 : vector<1x40x40xbf16> to vector<40x40xbf16>
    %363 = arith.truncf %360 : vector<16x40xf32> to vector<16x40xbf16>
    %cst_175 = arith.constant dense<0.000000e+00> : vector<16x40xf32>
    %364 = tpu.matmul %363, %362, %cst_175 {dimension_numbers = #tpu.dot_dimension_numbers<[1], [0], [0], [1], [0, 0, 1, 1], [], []>} : vector<16x40xbf16>, vector<40x40xbf16>, vector<16x40xf32> -> vector<16x40xf32>
    %c3_176 = arith.constant 3 : index
    %c0_177 = arith.constant 0 : index
    %c0_178 = arith.constant 0 : index
    %365 = vector.load %arg17[%c3_176, %c0_177, %c0_178] : memref<4x1x40xf32, #tpu.memory_space<vmem>>, vector<1x1x40xf32>
    %366 = vector.shape_cast %365 : vector<1x1x40xf32> to vector<1x40xf32>
    %367 = vector.broadcast %366 : vector<1x40xf32> to vector<16x40xf32>
    %368 = arith.addf %364, %367 : vector<16x40xf32>
    %369 = vector.extract_strided_slice %368 {offsets = [0, 0], sizes = [16, 32], strides = [1, 1]} : vector<16x40xf32> to vector<16x32xf32>
    %370 = arith.truncf %369 : vector<16x32xf32> to vector<16x32xbf16>
    %cst_179 = arith.constant dense<0.000000e+00> : vector<10x32xf32>
    %371 = tpu.matmul %13, %370, %cst_179 {dimension_numbers = #tpu.dot_dimension_numbers<[1], [0], [0], [1], [0, 0, 1, 1], [], []>} : vector<10x16xbf16>, vector<16x32xbf16>, vector<10x32xf32> -> vector<10x32xf32>
    %cst_180 = arith.constant 2.000000e+00 : f32
    %372 = vector.broadcast %cst_180 : f32 to vector<10x32xf32>
    %373 = arith.mulf %372, %288 : vector<10x32xf32>
    %374 = arith.addf %373, %371 : vector<10x32xf32>
    %cst_181 = arith.constant dense<0.000000e+00> : vector<6x32xf32>
    %375 = tpu.matmul %19, %374, %cst_181 {dimension_numbers = #tpu.dot_dimension_numbers<[1], [0], [0], [1], [0, 0, 1, 1], [], []>} : vector<6x10xf32>, vector<10x32xf32>, vector<6x32xf32> -> vector<6x32xf32>
    %c0_182 = arith.constant 0 : index
    %c0_183 = arith.constant 0 : index
    %376 = vector.load %arg18[%c0_182, %c0_183] : memref<1x32xf32, #tpu.memory_space<vmem>>, vector<1x32xf32>
    %cst_184 = arith.constant dense<0.000000e+00> : vector<1x6xf32>
    %377 = tpu.matmul %376, %375, %cst_184 {dimension_numbers = #tpu.dot_dimension_numbers<[1], [1], [0], [0], [0, 0, 1, 0], [], []>} : vector<1x32xf32>, vector<6x32xf32>, vector<1x6xf32> -> vector<1x6xf32>
    %c0_185 = arith.constant 0 : index
    %c0_186 = arith.constant 0 : index
    %378 = vector.load %arg19[%c0_185, %c0_186] : memref<1x1xf32, #tpu.memory_space<vmem>>, vector<1x1xf32>
    %379 = vector.broadcast %378 : vector<1x1xf32> to vector<1x6xf32>
    %380 = arith.addf %377, %379 : vector<1x6xf32>
    %381 = tpu.iota {dimensions = array<i32: 0>} : vector<2x6xi32>
    %c0_187 = arith.constant 0 : index
    %c0_188 = arith.constant 0 : index
    %382 = vector.load %arg5[%c0_187, %c0_188] : memref<1x6xi32, #tpu.memory_space<vmem>>, vector<1x6xi32>
    %383 = vector.broadcast %382 : vector<1x6xi32> to vector<2x6xi32>
    %384 = arith.cmpi eq, %381, %383 : vector<2x6xi32>
    %385 = arith.extui %384 : vector<2x6xi1> to vector<2x6xi32>
    %386 = arith.sitofp %385 : vector<2x6xi32> to vector<2x6xf32>
    %cst_189 = arith.constant -1.000000e+30 : f32
    %387 = vector.shape_cast %380 : vector<1x6xf32> to vector<1x6xf32>
    %388 = vector.broadcast %387 : vector<1x6xf32> to vector<2x6xf32>
    %389 = vector.broadcast %cst_189 : f32 to vector<2x6xf32>
    %390 = arith.select %384, %388, %389 : vector<2x6xi1>, vector<2x6xf32>
    %cst_190 = arith.constant dense<0xFF800000> : vector<2xf32>
    %391 = vector.multi_reduction <maximumf>, %390, %cst_190 [1] : vector<2x6xf32> to vector<2xf32>
    %392 = vector.shape_cast %391 : vector<2xf32> to vector<2x1xf32>
    %393 = vector.broadcast %392 : vector<2x1xf32> to vector<2x6xf32>
    %394 = arith.mulf %386, %393 : vector<2x6xf32>
    %cst_191 = arith.constant dense<0.000000e+00> : vector<6xf32>
    %395 = vector.multi_reduction <add>, %394, %cst_191 [0] : vector<2x6xf32> to vector<6xf32>
    %396 = vector.shape_cast %395 : vector<6xf32> to vector<1x6xf32>
    %397 = arith.subf %380, %396 : vector<1x6xf32>
    %398 = math.exp %397 : vector<1x6xf32>
    %399 = vector.broadcast %398 : vector<1x6xf32> to vector<2x6xf32>
    %400 = arith.mulf %386, %399 : vector<2x6xf32>
    %cst_192 = arith.constant dense<0.000000e+00> : vector<2xf32>
    %401 = vector.multi_reduction <add>, %400, %cst_192 [1] : vector<2x6xf32> to vector<2xf32>
    %402 = vector.shape_cast %401 : vector<2xf32> to vector<2x1xf32>
    %cst_193 = arith.constant dense<0.000000e+00> : vector<2xf32>
    %403 = vector.multi_reduction <add>, %386, %cst_193 [1] : vector<2x6xf32> to vector<2xf32>
    %404 = vector.shape_cast %403 : vector<2xf32> to vector<2x1xf32>
    %cst_194 = arith.constant 0.000000e+00 : f32
    %405 = vector.broadcast %cst_194 : f32 to vector<2x1xf32>
    %406 = arith.cmpf ogt, %404, %405 : vector<2x1xf32>
    %cst_195 = arith.constant 1.000000e+00 : f32
    %407 = vector.broadcast %cst_195 : f32 to vector<2x1xf32>
    %408 = arith.select %406, %402, %407 : vector<2x1xi1>, vector<2x1xf32>
    %409 = math.log %408 : vector<2x1xf32>
    %410 = vector.broadcast %409 : vector<2x1xf32> to vector<2x6xf32>
    %411 = arith.mulf %386, %410 : vector<2x6xf32>
    %cst_196 = arith.constant dense<0.000000e+00> : vector<6xf32>
    %412 = vector.multi_reduction <add>, %411, %cst_196 [0] : vector<2x6xf32> to vector<6xf32>
    %413 = vector.shape_cast %412 : vector<6xf32> to vector<1x6xf32>
    %414 = arith.subf %397, %413 : vector<1x6xf32>
    %c0_197 = arith.constant 0 : index
    %c0_198 = arith.constant 0 : index
    %415 = vector.load %arg20[%c0_197, %c0_198] : memref<1x6xf32, #tpu.memory_space<vmem>>, vector<1x6xf32>
    tpu.vector_store %arg20[%c0_197, %c0_198], %414 {strides = array<i32>} : memref<1x6xf32, #tpu.memory_space<vmem>>, vector<1x6xf32>,
    return
  }
}

</mosaic_0001>

<bundles_post_ra>
// kernel: tpu_custom_call.1
= control target key start
LH: loop header
LB: loop body
LE: loop exit
PB: predicated region body
PF: predicated region fallthrough
CT: control target
= control target key end

     0   :  { %s3326_s0 = inlined_call_operand.vmem [shape: f32[10,2], index: 0, kind: input, shape index: {}]   ;;  %s3327_s1 = inlined_call_operand.vmem [shape: f32[16,1], index: 1, kind: input, shape index: {}]   ;;  %s3328_s2 = inlined_call_operand.vmem [shape: s32[32,1], index: 2, kind: input, shape index: {}]   ;;  %s3329_s3 = inlined_call_operand.vmem [shape: s32[1,16], index: 3, kind: input, shape index: {}]   ;;  %s3330_s4 = inlined_call_operand.vmem [shape: s32[6,1], index: 4, kind: input, shape index: {}]   ;;  %s3331_s5 = inlined_call_operand.vmem [shape: s32[1,6], index: 5, kind: input, shape index: {}]   ;;  %s3332_s6 = inlined_call_operand.vmem [shape: bf16[2,32], index: 6, kind: input, shape index: {}]   ;;  %s3333_s7 = inlined_call_operand.vmem [shape: f32[1,32], index: 7, kind: input, shape index: {}]   ;;  %s3334_s8 = inlined_call_operand.vmem [shape: f32[1,8], index: 8, kind: input, shape index: {}]   ;;  %s3335_s9 = inlined_call_operand.vmem [shape: f32[1,8], index: 9, kind: input, shape index: {}]   ;;  %s3336_s10 = inlined_call_operand.vmem [shape: bf16[4,72,40], index: 10, kind: input, shape index: {}]   ;;  %s3337_s11 = inlined_call_operand.vmem [shape: f32[4,1,40], index: 11, kind: input, shape index: {}]   ;;  %s3338_s12 = inlined_call_operand.vmem [shape: f32[4,1,32], index: 12, kind: input, shape index: {}]   ;;  %s3339_s13 = inlined_call_operand.vmem [shape: f32[4,1,32], index: 13, kind: input, shape index: {}]   ;;  %s3340_s14 = inlined_call_operand.vmem [shape: f32[4,1,8], index: 14, kind: input, shape index: {}]   ;;  %s3341_s15 = inlined_call_operand.vmem [shape: f32[4,1,8], index: 15, kind: input, shape index: {}]   ;;  %s3342_s16 = inlined_call_operand.vmem [shape: bf16[4,40,40], index: 16, kind: input, shape index: {}]   ;;  %s3343_s17 = inlined_call_operand.vmem [shape: f32[4,1,40], index: 17, kind: input, shape index: {}]   ;;  %s3344_s18 = inlined_call_operand.vmem [shape: f32[1,32], index: 18, kind: input, shape index: {}]   ;;  %s3345_s19 = inlined_call_operand.<no memory space> [shape: f32[1,1], index: 19, kind: input, shape index: {}]   ;;  %s3346_s20 = inlined_call_operand.hbm [shape: f32[1,6], index: 20, kind: output, shape index: {}]  }
   0x1   :  { %3350 = sst [smem:[#allocation6_spill]] %s3326_s0  ;;  %v25_v0 = vstv %s3345_s19 }
   0x2   :  { %3351 = sst [smem:[#allocation7_spill]] %s3327_s1  ;;  %26 = vst [vmem:[#allocation2] sm:$0x1] %v25_v0 }
   0x3   :  { %3352 = sst [smem:[#allocation8_spill]] %s3328_s2 }
   0x4   :  { %3353 = sst [smem:[#allocation9_spill]] %s3329_s3 }
   0x5   :  { %3354 = sst [smem:[#allocation10_spill]] %s3330_s4 }
   0x6   :  { %v125_v1 = vld [vmem:[%s3332_s6] sm:$0x1]  ;;  %vm138_vm0 = vcmask 1040384   ;;  %s3355_s3 = sld [smem:[#allocation6_spill]]  ;;  %v2647_v3 = vmov 0.0   ;;  %vm2648_vm1 = vmmov 0  }
   0x7   :  { %2342 = vmatprep.subr.bf16.mxu0 %v2647_v3  ;;  %v140_v4 = vsel %vm138_vm0, %v125_v1, 0  ;;  %2344 = vmatprep.mubr.msk.bf16.mxu0 %vm2648_vm1, %v2647_v3  ;;  %s3356_s6 = sld [smem:[#allocation8_spill]]  ;;  %vm134_vm2 = vcmask 15360   ;;  %v2649_v8 = vmov 0  }
   0x8   :  { %2343 = vmatpush3.bf16.msra.mxu0 %v140_v4  ;;  %2516 = vset.pattern.permute.xlu1 %v2649_v8  ;;  %s3357_s24 = sld [smem:[#allocation7_spill]] }
   0x9   :  { %2515 = vset.pattern.permute.xlu0 %v2649_v8  ;;  %2354 = vmatprep.subr.bf16.mxu0 %v2647_v3 }
   0xc   :  { %v123_v2 = vld [vmem:[%s3355_s3] sm:$0xff]  ;;  %v124_v5 = vld [vmem:[%s3355_s3 + $0x8] sm:$0x3] }
   0xd   :  { %v71_v6 = vld [vmem:[%s3356_s6 + $0x10] sm:$0xff]  ;;  %v126_v7 = vpack.c.bf16 %v124_v5, %v123_v2  ;;  %v69_v9 = vld [vmem:[%s3356_s6] sm:$0xff]  ;;  %v72_v10 = vld [vmem:[%s3356_s6 + $0x18] sm:$0xff] }
   0xe   :  { %82 = vperm.xlu1 %2516, %v71_v6   ;;  %v70_v11 = vld [vmem:[%s3356_s6 + $0x8] sm:$0xff]  ;;  %76 = vperm.xlu0 %2515, %v69_v9   ;;  %v183_v13 = vld [vmem:[%s3357_s24] sm:$0xff] }
   0xf   :  { %2345 = vmatmul.mubr.msk.bf16.vlgmr.msra.gmra.mxu0 %vm134_vm2, %v126_v7  ;;  %v184_v12 = vld [vmem:[%s3357_s24 + $0x8] sm:$0xff] }
  0x10   :  { %2364 = vmatprep.mubr.msk.bf16.mxu0 %vm2648_vm1, %v2647_v3 }
  0x12   :  { %85 = vperm.xlu1 %2516, %v72_v10   ;;  %79 = vperm.xlu0 %2515, %v70_v11  }
  0x16   :  { %193 = vperm.xlu1 %2516, %v184_v12   ;;  %188 = vperm.xlu0 %2515, %v183_v13  }
  0x17   :  { %27 = vsyncpa [#allocation4], 0  ;;  %v73_v14 = vlaneseq  ;;  %v2131_v23 = vld [vmem:[%s3334_s8] ss:$0 sm:$0xff]  ;;  %vm214_vm7 = vcmask 80896   ;;  %s2650_s8 = smov 64  }
  0x18   :  { %v2132_v27 = vld [vmem:[%s3335_s9] ss:$0 sm:$0xff]  ;;  %vm221_vm8 = vcmask 1044480   ;;  %vm344_vm9 = vcmask 1043456   ;;  %v2558_v46 = vld [vmem:[%s3336_s10 + $0x18] sm:$0xff]   ;;  %v2559_v47 = vld [vmem:[%s3336_s10 + $0x10] sm:$0xff]  }
  0x19   :  { %v2796_v15 = vand.u32 127, %v73_v14  ;;  %v2129_v36 = vld [vmem:[%s3333_s7] ss:$0 sm:$0xff]  ;;  %v2560_v48 = vld [vmem:[%s3336_s10 + $0x8] sm:$0xff]   ;;  %s2651_s24 = smov 32   ;;  %vm290_vm10 = vcmask 261120  }
  0x1a   :  { %v2557_v44 = vld [vmem:[%s3336_s10 + $0x20] ss:$0 sps:$4 sm:$0xff]   ;;  %vm293_vm11 = vcmask 523264   ;;  %vm340_vm12 = vcmask 588800   ;;  %s2652_s3 = smov 96   ;;  %vm446_vm13 = vcmask 64512  }
  0x1b   :  { %v346_v45 = vsel %vm344_vm9, %v2557_v44, 0  ;;  %v2561_v49 = vld [vmem:[%s3336_s10] sm:$0xff]   ;;  %vm534_vm14 = vcmask 326656   ;;  %s3358_s19 = sld [smem:[#allocation9_spill]]  ;;  %vm583_vm2 = vcmask 130048  }
  0x1c   :  { %2355 = vmatpush3.bf16.msra.mxu0 %v346_v45  ;;  %v2135_v2 = vld [vmem:[%s3337_s11] ss:$0 sm:$0xff]  ;;  %s3359_s27 = sld [smem:[#allocation10_spill]] }
  0x1d   :  { %2356 = vmatprep.subr.bf16.mxu0 %v2647_v3 }
  0x20   :  { %2357 = vmatpush3.bf16.msra.mxu0 %v2558_v46  ;;  %v2144_v46 = vld [vmem:[%s3340_s14] ss:$0 sm:$0xff] }
  0x21   :  { %2358 = vmatprep.subr.bf16.mxu0 %v2647_v3 }
  0x24   :  { %2359 = vmatpush3.bf16.msra.mxu0 %v2559_v47  ;;  %v2145_v47 = vld [vmem:[%s3341_s15] ss:$0 sm:$0xff] }
  0x25   :  { %2360 = vmatprep.subr.bf16.mxu0 %v2647_v3 }
  0x28   :  { %2361 = vmatpush3.bf16.msra.mxu0 %v2560_v48  ;;  %v2562_v48 = vld [vmem:[%s3342_s16 + $0x10] ss:$0 sps:$4 sm:$0xff]  }
  0x29   :  { %2362 = vmatprep.subr.bf16.mxu0 %v2647_v3 }
  0x2c   :  { %2363 = vmatpush3.bf16.msra.mxu0 %v2561_v49  ;;  %v539_v49 = vsel %vm344_vm9, %v2562_v48, 0 }
  0x89   :  { %v83_v16 = vpop.permute.xlu1 %82  ;;  %v77_v17 = vpop.permute.xlu0 %76 }
  0x8a   :  { %vm89_vm3 = vcmp.eq.s32.totalorder %v83_v16, %v2796_v15  ;;  %vm87_vm4 = vcmp.eq.s32.totalorder %v77_v17, %v2796_v15 }
  0x8b   :  { %v2123_v18 = vsel %vm89_vm3, 1.0, %v2647_v3  ;;  %v2121_v20 = vsel %vm87_vm4, 1.0, %v2647_v3  ;;  %vm1892_vm3 = vcmask 1041408  }
  0x8d   :  { %v86_v19 = vpop.permute.xlu1 %85  ;;  %v80_v21 = vpop.permute.xlu0 %79 }
  0x8e   :  { %vm90_vm5 = vcmp.eq.s32.totalorder %v86_v19, %v2796_v15  ;;  %vm88_vm6 = vcmp.eq.s32.totalorder %v80_v21, %v2796_v15 }
  0x8f   :  { %v2124_v22 = vsel %vm90_vm5, 1.0, %v2647_v3  ;;  %v2122_v25 = vsel %vm88_vm6, 1.0, %v2647_v3  ;;  %vm2066_vm5 = vcmask 41984  }
  0x90   :  { %v2808_v24 = vpack.c.bf16 %v2124_v22, %v2123_v18  ;;  %v2811_v26 = vpack.c.bf16 %v2122_v25, %v2121_v20 }
  0x91   :  { %v194_v28 = vpop.permute.xlu1 %193  ;;  %v189_v30 = vpop.permute.xlu0 %188 }
  0x92   :  { %v203_v29 = vmul.f32 %v2131_v23, %v194_v28  ;;  %v202_v31 = vmul.f32 %v2131_v23, %v189_v30  ;;  %2350 = vmatprep.mubr.msk.bf16.mxu1 %vm214_vm7, %v2811_v26 }
  0x94   :  { %v2818_v32 = vadd.f32 %v2132_v27, %v203_v29  ;;  %v2820_v33 = vadd.f32 %v2132_v27, %v202_v31 }
  0x96   :  { %v2522_v34 = vpack.i.bf16 %v2818_v32, %v2820_v33 }
  0x98   :  { %2523 = vrot.lane.b32.xlu1 %v2522_v34, %s2650_s8 }
  0xcf   :  { %v176_v35 = vpop.f32.mrf.mxu0 }
  0xd0   :  { %v2828_v39 = vadd.f32 %v2129_v36, %v176_v35 }
  0xd1   :  { %v2346_v37 = vpop.f32.mrf.mxu0 }
  0xd3   :  { %v179_v38 = vpop.f32.mrf.mxu0 }
  0xd4   :  { %v2830_v40 = vadd.f32 %v2129_v36, %v179_v38 }
  0xd5   :  { %v2347_v41 = vpop.f32.mrf.mxu0 }
  0xd6   :  { %v213_v42 = vpack.c.bf16 %v2830_v40, %v2828_v39 }
  0xd8   :  { %2504 = vmatprep.subr.msk.bf16.mxu1 %vm221_vm8, %v213_v42  ;;  %v223_v43 = vsel %vm221_vm8, %v213_v42, 0 }
  0xd9   :  { %2349 = vmatpush3.bf16.msra.mxu1 %v223_v43 }
  0xda   :  { %2368 = vmatprep.subr.bf16.mxu1 %v2647_v3 }
  0xdc   :  { %2351 = vmatmul.mubr.msk.bf16.vlgmr.msra.gmra.mxu1 %vm214_vm7, %v2808_v24 }
  0xdd   :  { %2374 = vmatprep.mubr.msk.bf16.mxu1 %vm2648_vm1, %v2647_v3  ;;  %2369 = vmatpush3.bf16.msra.mxu1 %v539_v49 }
  0xde   :  { %2370 = vmatprep.subr.bf16.mxu1 %v2647_v3 }
 0x10a   :  { %v2524_v54 = vpop.permute.xlu1 %2523 }
 0x10b   :  { %v2526_v58 = vunpack.i.h.bf16 %v2524_v54  ;;  %v2525_v59 = vunpack.i.l.bf16 %v2524_v54 }
 0x19c   :  { %v2352_v50 = vpop.f32.mrf.mxu1 }
 0x19e   :  { %v259_v51 = vpop.f32.mrf.mxu1 }
 0x1a0   :  { %v2353_v52 = vpop.f32.mrf.mxu1 }
 0x1a1   :  { %v2517_v53 = vpack.i.bf16 %v2353_v52, %v2352_v50  ;;  %v2563_v50 = vld [vmem:[%s3342_s16 + $0x8] sm:$0xff]  }
 0x1a2   :  { %v262_v60 = vpop.f32.mrf.mxu1  ;;  %2371 = vmatpush3.bf16.msra.mxu1 %v2563_v50  ;;  %v632_v50 = vmul.f32 2.0, %v2820_v33 }
 0x1a3   :  { %2518 = vrot.lane.b32.xlu0 %v2517_v53, %s2651_s24  ;;  %2372 = vmatprep.subr.bf16.mxu1 %v2647_v3 }
 0x215   :  { %v2519_v55 = vpop.permute.xlu0 %2518 }
 0x216   :  { %v2521_v56 = vunpack.i.h.bf16 %v2519_v55  ;;  %v2520_v57 = vunpack.i.l.bf16 %v2519_v55 }
 0x218   :  { %v292_v61 = vsel %vm290_vm10, %v262_v60, %v2521_v56  ;;  %v291_v62 = vsel %vm290_vm10, %v259_v51, %v2520_v57  ;;  %v2564_v51 = vld [vmem:[%s3342_s16] sm:$0xff]  }
 0x219   :  { %v295_v63 = vsel %vm293_vm11, %v292_v61, %v2526_v58  ;;  %v294_v0 = vsel %vm293_vm11, %v291_v62, %v2525_v59  ;;  %2373 = vmatpush3.bf16.msra.mxu1 %v2564_v51  ;;  %v633_v51 = vmul.f32 2.0, %v2818_v32 }
 0x21a   :  { %v305_v1 = vpack.c.bf16 %v295_v63, %v294_v0  ;;  %2378 = vmatprep.subr.bf16.mxu1 %v2647_v3 }
 0x21c   :  { %2365 = vmatmul.mubr.msk.bf16.vlgmr.msra.gmra.mxu0 %vm340_vm12, %v305_v1 }
 0x21d   :  { %2386 = vmatprep.mubr.msk.bf16.mxu0 %vm214_vm7, %v2811_v26 }
 0x2dc   :  { %v382_v4 = vpop.f32.mrf.mxu0 }
 0x2dd   :  { %v383_v5 = vadd.f32 %v2135_v2, %v382_v4 }
 0x2de   :  { %v2366_v6 = vpop.f32.mrf.mxu0 }
 0x2df   :  { %440 = vrot.lane.b32.xlu0 %v383_v5, %s2652_s3  ;;  %v391_v13 = vsel %vm290_vm10, %v383_v5, 0.0 }
 0x2e0   :  { %v385_v7 = vpop.f32.mrf.mxu0 }
 0x2e1   :  { %v386_v8 = vadd.f32 %v2135_v2, %v385_v7  ;;  %v2142_v7 = vld [vmem:[%s3338_s12] ss:$0 sm:$0xff] }
 0x2e2   :  { %v2367_v9 = vpop.f32.mrf.mxu0 }
 0x2e3   :  { %442 = vrot.lane.b32.xlu1 %v386_v8, %s2652_s3  ;;  %v394_v17 = vsel %vm290_vm10, %v386_v8, 0.0 }
 0x351   :  { %v441_v10 = vpop.permute.xlu0 %440 }
 0x352   :  { %v447_v11 = vsel %vm446_vm13, %v441_v10, 0.0 }
 0x353   :  { %448 = vadd.xlane.f32.xlu0 %v447_v11 }
 0x355   :  { %v443_v12 = vpop.permute.xlu1 %442 }
 0x356   :  { %v450_v16 = vsel %vm446_vm13, %v443_v12, 0.0 }
 0x357   :  { %392 = vadd.xlane.f32.xlu0 %v391_v13  ;;  %451 = vadd.xlane.f32.xlu1 %v450_v16  ;;  %v2143_v16 = vld [vmem:[%s3339_s13] ss:$0 sm:$0xff] }
 0x35b   :  { %395 = vadd.xlane.f32.xlu0 %v394_v17 }
 0x3dc   :  { %v449_v18 = vpop.xlane.xlu0 %448 }
 0x3dd   :  { %v454_v19 = vmul.f32 0.125, %v449_v18 }
 0x3df   :  { %v2878_v20 = vsub.f32 %v383_v5, %v454_v19 }
 0x3e0   :  { %v452_v21 = vpop.xlane.xlu1 %451  ;;  %v393_v28 = vpop.xlane.xlu0 %392 }
 0x3e1   :  { %v455_v22 = vmul.f32 0.125, %v452_v21  ;;  %v458_v23 = vmul.f32 %v2878_v20, %v2878_v20  ;;  %v398_v31 = vmul.f32 0.03125, %v393_v28 }
 0x3e3   :  { %v2882_v25 = vsub.f32 %v386_v8, %v455_v22  ;;  %462 = vrot.lane.b32.xlu1 %v458_v23, %s2652_s3  ;;  %v400_v35 = vsub.f32 %v383_v5, %v398_v31 }
 0x3e4   :  { %v396_v29 = vpop.xlane.xlu0 %395 }
 0x3e5   :  { %v459_v27 = vmul.f32 %v2882_v25, %v2882_v25  ;;  %v399_v30 = vmul.f32 0.03125, %v396_v29  ;;  %v402_v37 = vmul.f32 %v400_v35, %v400_v35 }
 0x3e7   :  { %464 = vrot.lane.b32.xlu0 %v459_v27, %s2652_s3  ;;  %v401_v34 = vsub.f32 %v386_v8, %v399_v30  ;;  %v404_v41 = vsel %vm290_vm10, %v402_v37, 0.0  ;;  %v2125_v37 = vld [vmem:[%s3358_s19] ss:$0 sm:$0xff] }
 0x3e9   :  { %v403_v36 = vmul.f32 %v401_v34, %v401_v34 }
 0x3eb   :  { %v407_v38 = vsel %vm290_vm10, %v403_v36, 0.0 }
 0x406   :  { %408 = vadd.xlane.f32.xlu0 %v407_v38 }
 0x407   :  { %405 = vadd.xlane.f32.xlu1 %v404_v41 }
 0x455   :  { %v463_v42 = vpop.permute.xlu1 %462 }
 0x456   :  { %v468_v43 = vsel %vm446_vm13, %v463_v42, 0.0 }
 0x457   :  { %469 = vadd.xlane.f32.xlu1 %v468_v43 }
 0x459   :  { %v465_v44 = vpop.permute.xlu0 %464 }
 0x45a   :  { %v471_v45 = vsel %vm446_vm13, %v465_v44, 0.0 }
 0x45b   :  { %472 = vadd.xlane.f32.xlu0 %v471_v45 }
 0x468   :  { %487 = vrot.lane.b32.xlu1 %v2144_v46, %s2651_s24 }
 0x471   :  { %497 = vrot.lane.b32.xlu0 %v2145_v47, %s2651_s24 }
 0x48f   :  { %v409_v52 = vpop.xlane.xlu0 %408 }
 0x490   :  { %v406_v53 = vpop.xlane.xlu1 %405  ;;  %v411_v54 = vmul.f32 0.03125, %v409_v52 }
 0x491   :  { %v410_v55 = vmul.f32 0.03125, %v406_v53 }
 0x492   :  { %v413_v56 = vadd.f32 1e-05, %v411_v54 }
 0x493   :  { %v412_v57 = vadd.f32 1e-05, %v410_v55 }
 0x494   :  { %2589 = vrsqrt.f32 %v413_v56 }
 0x495   :  { %2591 = vrsqrt.f32 %v412_v57 }
 0x4a1   :  { %v2590_v0 = vpop.eup %2589 }
 0x4a2   :  { %v2592_v1 = vpop.eup %2591  ;;  %v417_v2 = vmul.f32 %v2590_v0, %v401_v34  ;;  %v2566_v0 = vld [vmem:[%s3336_s10 + $0x3c] sm:$0xff]  }
 0x4a3   :  { %v416_v4 = vmul.f32 %v2592_v1, %v400_v35  ;;  %v2146_v35 = vld [vmem:[%s3343_s17] ss:$0 sm:$0xff]  ;;  %v2567_v1 = vld [vmem:[%s3336_s10 + $0x34] sm:$0xff]  }
 0x4a4   :  { %v425_v12 = vmul.f32 %v2142_v7, %v417_v2  ;;  %v2568_v2 = vld [vmem:[%s3336_s10 + $0x2c] sm:$0xff]  }
 0x4a5   :  { %v424_v11 = vmul.f32 %v2142_v7, %v416_v4  ;;  %v2569_v4 = vld [vmem:[%s3336_s10 + $0x24] sm:$0xff]  }
 0x4a6   :  { %v433_v22 = vadd.f32 %v2143_v16, %v425_v12 }
 0x4a7   :  { %v432_v21 = vadd.f32 %v2143_v16, %v424_v11 }
 0x4a8   :  { %v435_v29 = vmax.f32 %v433_v22, 0.0 }
 0x4a9   :  { %v434_v28 = vmax.f32 %v432_v21, 0.0 }
 0x4e0   :  { %v470_v58 = vpop.xlane.xlu1 %469 }
 0x4e1   :  { %v474_v59 = vmul.f32 0.125, %v470_v58  ;;  %v628_v58 = vmul.f32 2.0, %v2828_v39  ;;  %v2565_v39 = vld [vmem:[%s3336_s10 + $0x44] ss:$0 sps:$4 sm:$0xff]  }
 0x4e3   :  { %v476_v60 = vadd.f32 1e-05, %v474_v59  ;;  %v629_v59 = vmul.f32 2.0, %v2830_v40  ;;  %v767_v40 = vsel %vm344_vm9, %v2565_v39, 0 }
 0x4e4   :  { %v473_v61 = vpop.xlane.xlu0 %472  ;;  %v488_v6 = vpop.permute.xlu1 %487 }
 0x4e5   :  { %2593 = vrsqrt.f32 %v476_v60  ;;  %v475_v62 = vmul.f32 0.125, %v473_v61 }
 0x4e7   :  { %v477_v63 = vadd.f32 1e-05, %v475_v62 }
 0x4e8   :  { %v498_v9 = vpop.permute.xlu0 %497 }
 0x4e9   :  { %2595 = vrsqrt.f32 %v477_v63 }
 0x4f2   :  { %v2594_v5 = vpop.eup %2593 }
 0x4f3   :  { %v480_v8 = vmul.f32 %v2594_v5, %v2878_v20 }
 0x4f5   :  { %v490_v10 = vmul.f32 %v488_v6, %v480_v8 }
 0x4f6   :  { %v2596_v13 = vpop.eup %2595 }
 0x4f7   :  { %v481_v17 = vmul.f32 %v2596_v13, %v2882_v25  ;;  %v500_v18 = vadd.f32 %v498_v9, %v490_v10  ;;  %v2927_v25 = vshrl.u32 %v73_v14, 7 }
 0x4f9   :  { %v491_v19 = vmul.f32 %v488_v6, %v481_v17  ;;  %v502_v27 = vmax.f32 %v500_v18, 0.0  ;;  %v103_v36 = vadd.s32 8, %v2927_v25  ;;  %vm109_vm15 = vcmp.eq.s32.totalorder %v2927_v25, %v2125_v37 }
 0x4fa   :  { %v2126_v44 = vsel %vm109_vm15, 1.0, %v2647_v3 }
 0x4fb   :  { %v501_v23 = vadd.f32 %v498_v9, %v491_v19  ;;  %v504_v30 = vsel %vm290_vm10, %v434_v28, %v502_v27  ;;  %vm110_vm0 = vcmp.eq.s32.totalorder %v103_v36, %v2125_v37  ;;  %v2164_v27 = vld [vmem:[%s3337_s11 + $0x1] ss:$0 sm:$0xff] }
 0x4fc   :  { %v2127_v45 = vsel %vm110_vm0, 1.0, %v2647_v3 }
 0x4fd   :  { %v503_v20 = vmax.f32 %v501_v23, 0.0  ;;  %v2941_v48 = vpack.c.bf16 %v2127_v45, %v2126_v44 }
 0x4ff   :  { %v505_v31 = vsel %vm290_vm10, %v435_v29, %v503_v20 }
 0x500   :  { %v511_v34 = vpack.c.bf16 %v505_v31, %v504_v30 }
 0x502   :  { %2375 = vmatmul.mubr.msk.bf16.vlgmr.msra.gmra.mxu1 %vm534_vm14, %v511_v34 }
 0x503   :  { %2380 = vmatprep.mubr.msk.bf16.mxu1 %vm2648_vm1, %v2647_v3 }
 0x5c2   :  { %v575_v38 = vpop.f32.mrf.mxu1 }
 0x5c3   :  { %v576_v41 = vadd.f32 %v2146_v35, %v575_v38 }
 0x5c4   :  { %v2376_v42 = vpop.f32.mrf.mxu1 }
 0x5c5   :  { %636 = vrot.lane.b32.xlu1 %v576_v41, %s2652_s3 }
 0x5c6   :  { %v578_v14 = vpop.f32.mrf.mxu1 }
 0x5c7   :  { %v579_v43 = vadd.f32 %v2146_v35, %v578_v14 }
 0x5c8   :  { %v2377_v46 = vpop.f32.mrf.mxu1 }
 0x5c9   :  { %v582_v47 = vpack.c.bf16 %v579_v43, %v576_v41  ;;  %638 = vrot.lane.b32.xlu1 %v579_v43, %s2652_s3 }
 0x5cb   :  { %2379 = vmatpush3.bf16.msra.mxu1 %v582_v47 }
 0x5cc   :  { %2390 = vmatprep.subr.bf16.mxu1 %v2647_v3 }
 0x5ce   :  { %2381 = vmatmul.mubr.msk.bf16.vlgmr.msra.gmra.mxu1 %vm583_vm2, %v2941_v48 }
 0x5cf   :  { %2400 = vmatprep.mubr.msk.bf16.mxu1 %vm2648_vm1, %v2647_v3  ;;  %2391 = vmatpush3.bf16.msra.mxu1 %v767_v40 }
 0x5d0   :  { %2392 = vmatprep.subr.bf16.mxu1 %v2647_v3 }
 0x5d3   :  { %2393 = vmatpush3.bf16.msra.mxu1 %v2566_v0 }
 0x5d4   :  { %2394 = vmatprep.subr.bf16.mxu1 %v2647_v3 }
 0x5d7   :  { %2395 = vmatpush3.bf16.msra.mxu1 %v2567_v1  ;;  %v2177_v1 = vld [vmem:[%s3340_s14 + $0x1] ss:$0 sm:$0xff] }
 0x5d8   :  { %2396 = vmatprep.subr.bf16.mxu1 %v2647_v3 }
 0x5db   :  { %2397 = vmatpush3.bf16.msra.mxu1 %v2568_v2  ;;  %v2178_v2 = vld [vmem:[%s3341_s15 + $0x1] ss:$0 sm:$0xff] }
 0x5dc   :  { %2398 = vmatprep.subr.bf16.mxu1 %v2647_v3 }
 0x5df   :  { %2399 = vmatpush3.bf16.msra.mxu1 %v2569_v4  ;;  %v2570_v4 = vld [vmem:[%s3342_s16 + $0x24] ss:$0 sps:$4 sm:$0xff]  }
 0x637   :  { %v637_v49 = vpop.permute.xlu1 %636 }
 0x638   :  { %v2950_v53 = vadd.f32 %v637_v49, %v632_v50 }
 0x63b   :  { %v639_v52 = vpop.permute.xlu1 %638 }
 0x63c   :  { %v2952_v54 = vadd.f32 %v639_v52, %v633_v51 }
 0x63e   :  { %v2532_v55 = vpack.i.bf16 %v2952_v54, %v2950_v53 }
 0x640   :  { %2533 = vrot.lane.b32.xlu1 %v2532_v55, %s2650_s8 }
 0x68e   :  { %v621_v56 = vpop.f32.mrf.mxu1 }
 0x68f   :  { %v2959_v33 = vadd.f32 %v628_v58, %v621_v56 }
 0x690   :  { %v2382_v57 = vpop.f32.mrf.mxu1 }
 0x692   :  { %v624_v60 = vpop.f32.mrf.mxu1 }
 0x693   :  { %v2961_v32 = vadd.f32 %v629_v59, %v624_v60 }
 0x694   :  { %v2383_v61 = vpop.f32.mrf.mxu1 }
 0x695   :  { %v644_v62 = vpack.c.bf16 %v2961_v32, %v2959_v33 }
 0x697   :  { %2505 = vmatprep.subr.msk.bf16.mxu0 %vm221_vm8, %v644_v62  ;;  %v646_v63 = vsel %vm221_vm8, %v644_v62, 0 }
 0x698   :  { %2385 = vmatpush3.bf16.msra.mxu0 %v646_v63 }
 0x699   :  { %2404 = vmatprep.subr.bf16.mxu0 %v2647_v3 }
 0x69b   :  { %2387 = vmatmul.mubr.msk.bf16.vlgmr.msra.gmra.mxu0 %vm214_vm7, %v2808_v24 }
 0x69c   :  { %2410 = vmatprep.mubr.msk.bf16.mxu0 %vm2648_vm1, %v2647_v3 }
 0x6b2   :  { %v2534_v9 = vpop.permute.xlu1 %2533 }
 0x6b3   :  { %v2536_v13 = vunpack.i.h.bf16 %v2534_v9  ;;  %v2535_v16 = vunpack.i.l.bf16 %v2534_v9 }
 0x75b   :  { %v2388_v5 = vpop.f32.mrf.mxu0 }
 0x75d   :  { %v682_v6 = vpop.f32.mrf.mxu0 }
 0x75f   :  { %v2389_v7 = vpop.f32.mrf.mxu0 }
 0x760   :  { %v2527_v8 = vpack.i.bf16 %v2389_v7, %v2388_v5  ;;  %v962_v5 = vsel %vm344_vm9, %v2570_v4, 0  ;;  %v2572_v7 = vld [vmem:[%s3342_s16 + $0x14] sm:$0xff]  }
 0x761   :  { %v685_v17 = vpop.f32.mrf.mxu0  ;;  %2405 = vmatpush3.bf16.msra.mxu0 %v962_v5 }
 0x762   :  { %2528 = vrot.lane.b32.xlu0 %v2527_v8, %s2651_s24  ;;  %2406 = vmatprep.subr.bf16.mxu0 %v2647_v3 }
 0x7d4   :  { %v2529_v10 = vpop.permute.xlu0 %2528 }
 0x7d5   :  { %v2531_v11 = vunpack.i.h.bf16 %v2529_v10  ;;  %v2530_v12 = vunpack.i.l.bf16 %v2529_v10 }
 0x7d7   :  { %v713_v18 = vsel %vm290_vm10, %v682_v6, %v2530_v12  ;;  %v714_v19 = vsel %vm290_vm10, %v685_v17, %v2531_v11  ;;  %v2571_v6 = vld [vmem:[%s3342_s16 + $0x1c] sm:$0xff]  }
 0x7d8   :  { %v715_v21 = vsel %vm293_vm11, %v713_v18, %v2535_v16  ;;  %v716_v22 = vsel %vm293_vm11, %v714_v19, %v2536_v13  ;;  %2407 = vmatpush3.bf16.msra.mxu0 %v2571_v6 }
 0x7d9   :  { %v727_v23 = vpack.c.bf16 %v716_v22, %v715_v21  ;;  %2408 = vmatprep.subr.bf16.mxu0 %v2647_v3 }
 0x7db   :  { %2401 = vmatmul.mubr.msk.bf16.vlgmr.msra.gmra.mxu1 %vm340_vm12, %v727_v23 }
 0x7dc   :  { %2422 = vmatprep.mubr.msk.bf16.mxu1 %vm214_vm7, %v2811_v26  ;;  %2409 = vmatpush3.bf16.msra.mxu0 %v2572_v7 }
 0x7dd   :  { %2414 = vmatprep.subr.bf16.mxu0 %v2647_v3 }
 0x89b   :  { %v803_v28 = vpop.f32.mrf.mxu1 }
 0x89c   :  { %v804_v29 = vadd.f32 %v2164_v27, %v803_v28 }
 0x89d   :  { %v2402_v20 = vpop.f32.mrf.mxu1 }
 0x89e   :  { %864 = vrot.lane.b32.xlu0 %v804_v29, %s2652_s3  ;;  %v814_v38 = vsel %vm290_vm10, %v804_v29, 0.0 }
 0x89f   :  { %v806_v30 = vpop.f32.mrf.mxu1 }
 0x8a0   :  { %v807_v31 = vadd.f32 %v2164_v27, %v806_v30 }
 0x8a1   :  { %v2403_v34 = vpop.f32.mrf.mxu1 }
 0x8a2   :  { %866 = vrot.lane.b32.xlu1 %v807_v31, %s2652_s3  ;;  %v817_v42 = vsel %vm290_vm10, %v807_v31, 0.0 }
 0x910   :  { %v865_v35 = vpop.permute.xlu0 %864 }
 0x911   :  { %v870_v36 = vsel %vm446_vm13, %v865_v35, 0.0 }
 0x912   :  { %871 = vadd.xlane.f32.xlu0 %v870_v36 }
 0x914   :  { %v867_v37 = vpop.permute.xlu1 %866 }
 0x915   :  { %v873_v41 = vsel %vm446_vm13, %v867_v37, 0.0 }
 0x916   :  { %815 = vadd.xlane.f32.xlu0 %v814_v38  ;;  %874 = vadd.xlane.f32.xlu1 %v873_v41 }
 0x91a   :  { %818 = vadd.xlane.f32.xlu0 %v817_v42  ;;  %v2174_v42 = vld [vmem:[%s3339_s13 + $0x1] ss:$0 sm:$0xff] }
 0x99b   :  { %v872_v14 = vpop.xlane.xlu0 %871 }
 0x99c   :  { %v876_v43 = vmul.f32 0.125, %v872_v14 }
 0x99e   :  { %v3009_v44 = vsub.f32 %v804_v29, %v876_v43 }
 0x99f   :  { %v875_v45 = vpop.xlane.xlu1 %874  ;;  %v816_v51 = vpop.xlane.xlu0 %815 }
 0x9a0   :  { %v877_v46 = vmul.f32 0.125, %v875_v45  ;;  %v880_v47 = vmul.f32 %v3009_v44, %v3009_v44  ;;  %v820_v56 = vmul.f32 0.03125, %v816_v51 }
 0x9a2   :  { %v3013_v49 = vsub.f32 %v807_v31, %v877_v46  ;;  %884 = vrot.lane.b32.xlu1 %v880_v47, %s2652_s3  ;;  %v822_v58 = vsub.f32 %v804_v29, %v820_v56 }
 0x9a3   :  { %v819_v52 = vpop.xlane.xlu0 %818 }
 0x9a4   :  { %v881_v50 = vmul.f32 %v3013_v49, %v3013_v49  ;;  %v821_v55 = vmul.f32 0.03125, %v819_v52  ;;  %v824_v60 = vmul.f32 %v822_v58, %v822_v58 }
 0x9a6   :  { %886 = vrot.lane.b32.xlu0 %v881_v50, %s2652_s3  ;;  %v823_v57 = vsub.f32 %v807_v31, %v821_v55  ;;  %v826_v62 = vsel %vm290_vm10, %v824_v60, 0.0  ;;  %v2173_v31 = vld [vmem:[%s3338_s12 + $0x1] ss:$0 sm:$0xff] }
 0x9a8   :  { %v825_v59 = vmul.f32 %v823_v57, %v823_v57 }
 0x9aa   :  { %v829_v61 = vsel %vm290_vm10, %v825_v59, 0.0 }
 0x9c5   :  { %830 = vadd.xlane.f32.xlu0 %v829_v61 }
 0x9c6   :  { %827 = vadd.xlane.f32.xlu1 %v826_v62 }
 0xa14   :  { %v885_v63 = vpop.permute.xlu1 %884 }
 0xa15   :  { %v890_v39 = vsel %vm446_vm13, %v885_v63, 0.0 }
 0xa16   :  { %891 = vadd.xlane.f32.xlu1 %v890_v39 }
 0xa18   :  { %v887_v40 = vpop.permute.xlu0 %886 }
 0xa19   :  { %v893_v0 = vsel %vm446_vm13, %v887_v40, 0.0 }
 0xa1a   :  { %894 = vadd.xlane.f32.xlu0 %v893_v0 }
 0xa27   :  { %909 = vrot.lane.b32.xlu1 %v2177_v1, %s2651_s24  ;;  %v1051_v1 = vmul.f32 2.0, %v2950_v53 }
 0xa30   :  { %919 = vrot.lane.b32.xlu0 %v2178_v2, %s2651_s24  ;;  %v1052_v2 = vmul.f32 2.0, %v2952_v54 }
 0xa4e   :  { %v831_v8 = vpop.xlane.xlu0 %830 }
 0xa4f   :  { %v828_v9 = vpop.xlane.xlu1 %827  ;;  %v833_v10 = vmul.f32 0.03125, %v831_v8 }
 0xa50   :  { %v832_v11 = vmul.f32 0.03125, %v828_v9 }
 0xa51   :  { %v835_v12 = vadd.f32 1e-05, %v833_v10  ;;  %v1047_v10 = vmul.f32 2.0, %v2959_v33  ;;  %v2573_v33 = vld [vmem:[%s3336_s10 + $0x68] ss:$0 sps:$4 sm:$0xff]  }
 0xa52   :  { %v834_v13 = vadd.f32 1e-05, %v832_v11  ;;  %v1048_v11 = vmul.f32 2.0, %v2961_v32  ;;  %v1186_v32 = vsel %vm344_vm9, %v2573_v33, 0 }
 0xa53   :  { %2597 = vrsqrt.f32 %v835_v12 }
 0xa54   :  { %2599 = vrsqrt.f32 %v834_v13 }
 0xa60   :  { %v2598_v23 = vpop.eup %2597 }
 0xa61   :  { %v2600_v27 = vpop.eup %2599  ;;  %v839_v28 = vmul.f32 %v2598_v23, %v823_v57 }
 0xa62   :  { %v838_v29 = vmul.f32 %v2600_v27, %v822_v58 }
 0xa63   :  { %v847_v38 = vmul.f32 %v2173_v31, %v839_v28 }
 0xa64   :  { %v846_v37 = vmul.f32 %v2173_v31, %v838_v29 }
 0xa65   :  { %v855_v47 = vadd.f32 %v2174_v42, %v847_v38 }
 0xa66   :  { %v854_v46 = vadd.f32 %v2174_v42, %v846_v37 }
 0xa67   :  { %v857_v55 = vmax.f32 %v855_v47, 0.0 }
 0xa68   :  { %v856_v52 = vmax.f32 %v854_v46, 0.0 }
 0xa9f   :  { %v892_v16 = vpop.xlane.xlu1 %891 }
 0xaa0   :  { %v896_v17 = vmul.f32 0.125, %v892_v16 }
 0xaa2   :  { %v898_v18 = vadd.f32 1e-05, %v896_v17 }
 0xaa3   :  { %v895_v19 = vpop.xlane.xlu0 %894  ;;  %v910_v30 = vpop.permute.xlu1 %909 }
 0xaa4   :  { %2601 = vrsqrt.f32 %v898_v18  ;;  %v897_v21 = vmul.f32 0.125, %v895_v19  ;;  %v2574_v18 = vld [vmem:[%s3336_s10 + $0x60] sm:$0xff]   ;;  %v2575_v19 = vld [vmem:[%s3336_s10 + $0x58] sm:$0xff]  }
 0xaa6   :  { %v899_v22 = vadd.f32 1e-05, %v897_v21  ;;  %v2576_v21 = vld [vmem:[%s3336_s10 + $0x50] sm:$0xff]  }
 0xaa7   :  { %v920_v35 = vpop.permute.xlu0 %919 }
 0xaa8   :  { %2603 = vrsqrt.f32 %v899_v22  ;;  %v2577_v22 = vld [vmem:[%s3336_s10 + $0x48] sm:$0xff]  }
 0xab1   :  { %v2602_v20 = vpop.eup %2601 }
 0xab2   :  { %v902_v34 = vmul.f32 %v2602_v20, %v3009_v44 }
 0xab4   :  { %v912_v36 = vmul.f32 %v910_v30, %v902_v34 }
 0xab5   :  { %v2604_v41 = vpop.eup %2603 }
 0xab6   :  { %v903_v14 = vmul.f32 %v2604_v41, %v3013_v49  ;;  %v922_v43 = vadd.f32 %v920_v35, %v912_v36  ;;  %v2185_v49 = vld [vmem:[%s3343_s17 + $0x1] ss:$0 sm:$0xff] }
 0xab8   :  { %v913_v45 = vmul.f32 %v910_v30, %v903_v14  ;;  %v924_v51 = vmax.f32 %v922_v43, 0.0 }
 0xaba   :  { %v923_v50 = vadd.f32 %v920_v35, %v913_v45  ;;  %v926_v56 = vsel %vm290_vm10, %v856_v52, %v924_v51  ;;  %v2203_v45 = vld [vmem:[%s3337_s11 + $0x2] ss:$0 sm:$0xff] }
 0xabc   :  { %v925_v44 = vmax.f32 %v923_v50, 0.0 }
 0xabe   :  { %v927_v57 = vsel %vm290_vm10, %v857_v55, %v925_v44 }
 0xabf   :  { %v934_v58 = vpack.c.bf16 %v927_v57, %v926_v56 }
 0xac1   :  { %2411 = vmatmul.mubr.msk.bf16.vlgmr.msra.gmra.mxu0 %vm534_vm14, %v934_v58 }
 0xac2   :  { %2416 = vmatprep.mubr.msk.bf16.mxu0 %vm2648_vm1, %v2647_v3 }
 0xb81   :  { %v998_v59 = vpop.f32.mrf.mxu0 }
 0xb82   :  { %v999_v60 = vadd.f32 %v2185_v49, %v998_v59 }
 0xb83   :  { %v2412_v61 = vpop.f32.mrf.mxu0 }
 0xb84   :  { %1055 = vrot.lane.b32.xlu1 %v999_v60, %s2652_s3 }
 0xb85   :  { %v1001_v62 = vpop.f32.mrf.mxu0 }
 0xb86   :  { %v1002_v63 = vadd.f32 %v2185_v49, %v1001_v62 }
 0xb87   :  { %v2413_v39 = vpop.f32.mrf.mxu0 }
 0xb88   :  { %v1005_v40 = vpack.c.bf16 %v1002_v63, %v999_v60  ;;  %1057 = vrot.lane.b32.xlu1 %v1002_v63, %s2652_s3 }
 0xb8a   :  { %2415 = vmatpush3.bf16.msra.mxu0 %v1005_v40 }
 0xb8b   :  { %2426 = vmatprep.subr.bf16.mxu0 %v2647_v3 }
 0xb8d   :  { %2417 = vmatmul.mubr.msk.bf16.vlgmr.msra.gmra.mxu0 %vm583_vm2, %v2941_v48 }
 0xb8e   :  { %2436 = vmatprep.mubr.msk.bf16.mxu0 %vm2648_vm1, %v2647_v3  ;;  %2427 = vmatpush3.bf16.msra.mxu0 %v1186_v32 }
 0xb8f   :  { %2428 = vmatprep.subr.bf16.mxu0 %v2647_v3 }
 0xb92   :  { %2429 = vmatpush3.bf16.msra.mxu0 %v2574_v18  ;;  %v2216_v18 = vld [vmem:[%s3340_s14 + $0x2] ss:$0 sm:$0xff] }
 0xb93   :  { %2430 = vmatprep.subr.bf16.mxu0 %v2647_v3 }
 0xb96   :  { %2431 = vmatpush3.bf16.msra.mxu0 %v2575_v19  ;;  %v2217_v19 = vld [vmem:[%s3341_s15 + $0x2] ss:$0 sm:$0xff] }
 0xb97   :  { %2432 = vmatprep.subr.bf16.mxu0 %v2647_v3 }
 0xb9a   :  { %2433 = vmatpush3.bf16.msra.mxu0 %v2576_v21  ;;  %v2578_v21 = vld [vmem:[%s3342_s16 + $0x38] ss:$0 sps:$4 sm:$0xff]  }
 0xb9b   :  { %2434 = vmatprep.subr.bf16.mxu0 %v2647_v3 }
 0xb9e   :  { %2435 = vmatpush3.bf16.msra.mxu0 %v2577_v22  ;;  %v1381_v22 = vsel %vm344_vm9, %v2578_v21, 0 }
 0xbf6   :  { %v1056_v0 = vpop.permute.xlu1 %1055 }
 0xbf7   :  { %v3069_v5 = vadd.f32 %v1056_v0, %v1051_v1 }
 0xbfa   :  { %v1058_v4 = vpop.permute.xlu1 %1057 }
 0xbfb   :  { %v3071_v6 = vadd.f32 %v1058_v4, %v1052_v2 }
 0xbfd   :  { %v2542_v7 = vpack.i.bf16 %v3071_v6, %v3069_v5 }
 0xbff   :  { %2543 = vrot.lane.b32.xlu1 %v2542_v7, %s2650_s8 }
 0xc4d   :  { %v1040_v8 = vpop.f32.mrf.mxu0 }
 0xc4e   :  { %v3078_v53 = vadd.f32 %v1047_v10, %v1040_v8 }
 0xc4f   :  { %v2418_v9 = vpop.f32.mrf.mxu0 }
 0xc51   :  { %v1043_v12 = vpop.f32.mrf.mxu0 }
 0xc52   :  { %v3080_v54 = vadd.f32 %v1048_v11, %v1043_v12 }
 0xc53   :  { %v2419_v13 = vpop.f32.mrf.mxu0 }
 0xc54   :  { %v1063_v16 = vpack.c.bf16 %v3080_v54, %v3078_v53 }
 0xc56   :  { %2506 = vmatprep.subr.msk.bf16.mxu1 %vm221_vm8, %v1063_v16  ;;  %v1065_v17 = vsel %vm221_vm8, %v1063_v16, 0 }
 0xc57   :  { %2421 = vmatpush3.bf16.msra.mxu1 %v1065_v17 }
 0xc58   :  { %2440 = vmatprep.subr.bf16.mxu1 %v2647_v3 }
 0xc5a   :  { %2423 = vmatmul.mubr.msk.bf16.vlgmr.msra.gmra.mxu1 %vm214_vm7, %v2808_v24 }
 0xc5b   :  { %2446 = vmatprep.mubr.msk.bf16.mxu1 %vm2648_vm1, %v2647_v3  ;;  %2441 = vmatpush3.bf16.msra.mxu1 %v1381_v22 }
 0xc5c   :  { %2442 = vmatprep.subr.bf16.mxu1 %v2647_v3 }
 0xc71   :  { %v2544_v20 = vpop.permute.xlu1 %2543 }
 0xc72   :  { %v2546_v35 = vunpack.i.h.bf16 %v2544_v20  ;;  %v2545_v36 = vunpack.i.l.bf16 %v2544_v20 }
 0xd1a   :  { %v2424_v23 = vpop.f32.mrf.mxu1 }
 0xd1c   :  { %v1101_v27 = vpop.f32.mrf.mxu1 }
 0xd1e   :  { %v2425_v28 = vpop.f32.mrf.mxu1 }
 0xd1f   :  { %v2537_v29 = vpack.i.bf16 %v2425_v28, %v2424_v23  ;;  %v2579_v23 = vld [vmem:[%s3342_s16 + $0x30] sm:$0xff]  }
 0xd20   :  { %v1104_v37 = vpop.f32.mrf.mxu1  ;;  %2443 = vmatpush3.bf16.msra.mxu1 %v2579_v23 }
 0xd21   :  { %2538 = vrot.lane.b32.xlu0 %v2537_v29, %s2651_s24  ;;  %2444 = vmatprep.subr.bf16.mxu1 %v2647_v3 }
 0xd93   :  { %v2539_v30 = vpop.permute.xlu0 %2538 }
 0xd94   :  { %v2541_v31 = vunpack.i.h.bf16 %v2539_v30  ;;  %v2540_v34 = vunpack.i.l.bf16 %v2539_v30 }
 0xd96   :  { %v1132_v38 = vsel %vm290_vm10, %v1101_v27, %v2540_v34  ;;  %v1133_v41 = vsel %vm290_vm10, %v1104_v37, %v2541_v31  ;;  %v2580_v27 = vld [vmem:[%s3342_s16 + $0x28] sm:$0xff]  }
 0xd97   :  { %v1134_v42 = vsel %vm293_vm11, %v1132_v38, %v2545_v36  ;;  %v1135_v14 = vsel %vm293_vm11, %v1133_v41, %v2546_v35  ;;  %2445 = vmatpush3.bf16.msra.mxu1 %v2580_v27 }
 0xd98   :  { %v1146_v43 = vpack.c.bf16 %v1135_v14, %v1134_v42  ;;  %2450 = vmatprep.subr.bf16.mxu1 %v2647_v3 }
 0xd9a   :  { %2437 = vmatmul.mubr.msk.bf16.vlgmr.msra.gmra.mxu0 %vm340_vm12, %v1146_v43 }
 0xd9b   :  { %2458 = vmatprep.mubr.msk.bf16.mxu0 %vm214_vm7, %v2811_v26 }
 0xe5a   :  { %v1222_v46 = vpop.f32.mrf.mxu0 }
 0xe5b   :  { %v1223_v47 = vadd.f32 %v2203_v45, %v1222_v46 }
 0xe5c   :  { %v2438_v50 = vpop.f32.mrf.mxu0 }
 0xe5d   :  { %1283 = vrot.lane.b32.xlu0 %v1223_v47, %s2652_s3  ;;  %v1233_v26 = vsel %vm290_vm10, %v1223_v47, 0.0 }
 0xe5e   :  { %v1225_v51 = vpop.f32.mrf.mxu0 }
 0xe5f   :  { %v1226_v52 = vadd.f32 %v2203_v45, %v1225_v51  ;;  %v2212_v51 = vld [vmem:[%s3338_s12 + $0x2] ss:$0 sm:$0xff] }
 0xe60   :  { %v2439_v55 = vpop.f32.mrf.mxu0 }
 0xe61   :  { %1285 = vrot.lane.b32.xlu1 %v1226_v52, %s2652_s3  ;;  %v1236_v49 = vsel %vm290_vm10, %v1226_v52, 0.0 }
 0xecf   :  { %v1284_v44 = vpop.permute.xlu0 %1283 }
 0xed0   :  { %v1289_v56 = vsel %vm446_vm13, %v1284_v44, 0.0 }
 0xed1   :  { %1290 = vadd.xlane.f32.xlu0 %v1289_v56 }
 0xed3   :  { %v1286_v57 = vpop.permute.xlu1 %1285 }
 0xed4   :  { %v1292_v58 = vsel %vm446_vm13, %v1286_v57, 0.0 }
 0xed5   :  { %1234 = vadd.xlane.f32.xlu0 %v1233_v26  ;;  %1293 = vadd.xlane.f32.xlu1 %v1292_v58  ;;  %v2213_v58 = vld [vmem:[%s3339_s13 + $0x2] ss:$0 sm:$0xff] }
 0xed9   :  { %1237 = vadd.xlane.f32.xlu0 %v1236_v49 }
 0xf5a   :  { %v1291_v59 = vpop.xlane.xlu0 %1290 }
 0xf5b   :  { %v1295_v60 = vmul.f32 0.125, %v1291_v59 }
 0xf5d   :  { %v3128_v61 = vsub.f32 %v1223_v47, %v1295_v60 }
 0xf5e   :  { %v1294_v62 = vpop.xlane.xlu1 %1293  ;;  %v1235_v1 = vpop.xlane.xlu0 %1234 }
 0xf5f   :  { %v1296_v63 = vmul.f32 0.125, %v1294_v62  ;;  %v1299_v39 = vmul.f32 %v3128_v61, %v3128_v61  ;;  %v1239_v7 = vmul.f32 0.03125, %v1235_v1 }
 0xf61   :  { %v3132_v40 = vsub.f32 %v1226_v52, %v1296_v63  ;;  %1303 = vrot.lane.b32.xlu1 %v1299_v39, %s2652_s3  ;;  %v1241_v9 = vsub.f32 %v1223_v47, %v1239_v7 }
 0xf62   :  { %v1238_v2 = vpop.xlane.xlu0 %1237 }
 0xf63   :  { %v1300_v0 = vmul.f32 %v3132_v40, %v3132_v40  ;;  %v1240_v4 = vmul.f32 0.03125, %v1238_v2  ;;  %v1243_v11 = vmul.f32 %v1241_v9, %v1241_v9 }
 0xf65   :  { %1305 = vrot.lane.b32.xlu0 %v1300_v0, %s2652_s3  ;;  %v1242_v8 = vsub.f32 %v1226_v52, %v1240_v4  ;;  %v1245_v13 = vsel %vm290_vm10, %v1243_v11, 0.0 }
 0xf67   :  { %v1244_v10 = vmul.f32 %v1242_v8, %v1242_v8 }
 0xf69   :  { %v1248_v12 = vsel %vm290_vm10, %v1244_v10, 0.0 }
 0xf84   :  { %1249 = vadd.xlane.f32.xlu0 %v1248_v12 }
 0xf85   :  { %1246 = vadd.xlane.f32.xlu1 %v1245_v13 }
 0xfd3   :  { %v1304_v16 = vpop.permute.xlu1 %1303 }
 0xfd4   :  { %v1309_v17 = vsel %vm446_vm13, %v1304_v16, 0.0 }
 0xfd5   :  { %1310 = vadd.xlane.f32.xlu1 %v1309_v17 }
 0xfd7   :  { %v1306_v33 = vpop.permute.xlu0 %1305 }
 0xfd8   :  { %v1312_v32 = vsel %vm446_vm13, %v1306_v33, 0.0 }
 0xfd9   :  { %1313 = vadd.xlane.f32.xlu0 %v1312_v32  ;;  %v1470_v32 = vmul.f32 2.0, %v3069_v5 }
 0xfe6   :  { %1328 = vrot.lane.b32.xlu1 %v2216_v18, %s2651_s24  ;;  %v1471_v18 = vmul.f32 2.0, %v3071_v6 }
 0xfef   :  { %1338 = vrot.lane.b32.xlu0 %v2217_v19, %s2651_s24 }
0x100d   :  { %v1250_v28 = vpop.xlane.xlu0 %1249 }
0x100e   :  { %v1247_v29 = vpop.xlane.xlu1 %1246  ;;  %v1252_v20 = vmul.f32 0.03125, %v1250_v28 }
0x100f   :  { %v1251_v30 = vmul.f32 0.03125, %v1247_v29  ;;  %v1466_v29 = vmul.f32 2.0, %v3078_v53  ;;  %v2581_v53 = vld [vmem:[%s3336_s10 + $0x8c] ss:$0 sps:$4 sm:$0xff]  }
0x1010   :  { %v1254_v31 = vadd.f32 1e-05, %v1252_v20  ;;  %v1467_v20 = vmul.f32 2.0, %v3080_v54  ;;  %v1605_v54 = vsel %vm344_vm9, %v2581_v53, 0  ;;  %v116_v53 = vld [vmem:[%s3359_s27] sm:$0x3f] }
0x1011   :  { %v1253_v34 = vadd.f32 1e-05, %v1251_v30 }
0x1012   :  { %2605 = vrsqrt.f32 %v1254_v31 }
0x1013   :  { %2607 = vrsqrt.f32 %v1253_v34 }
0x101f   :  { %v2606_v14 = vpop.eup %2605 }
0x1020   :  { %v2608_v43 = vpop.eup %2607  ;;  %v1258_v45 = vmul.f32 %v2606_v14, %v1242_v8 }
0x1021   :  { %v1257_v46 = vmul.f32 %v2608_v43, %v1241_v9 }
0x1022   :  { %v1266_v57 = vmul.f32 %v2212_v51, %v1258_v45 }
0x1023   :  { %v1265_v56 = vmul.f32 %v2212_v51, %v1257_v46 }
0x1024   :  { %v1274_v63 = vadd.f32 %v2213_v58, %v1266_v57 }
0x1025   :  { %v1273_v62 = vadd.f32 %v2213_v58, %v1265_v56 }
0x1026   :  { %v1276_v2 = vmax.f32 %v1274_v63, 0.0 }
0x1027   :  { %v1275_v1 = vmax.f32 %v1273_v62, 0.0 }
0x105e   :  { %v1311_v35 = vpop.xlane.xlu1 %1310 }
0x105f   :  { %v1315_v36 = vmul.f32 0.125, %v1311_v35 }
0x1061   :  { %v1317_v37 = vadd.f32 1e-05, %v1315_v36  ;;  %v2582_v36 = vld [vmem:[%s3336_s10 + $0x84] sm:$0xff]  }
0x1062   :  { %v1314_v38 = vpop.xlane.xlu0 %1313  ;;  %v1329_v50 = vpop.permute.xlu1 %1328 }
0x1063   :  { %2609 = vrsqrt.f32 %v1317_v37  ;;  %v1316_v41 = vmul.f32 0.125, %v1314_v38  ;;  %v2584_v37 = vld [vmem:[%s3336_s10 + $0x74] sm:$0xff]   ;;  %v2585_v38 = vld [vmem:[%s3336_s10 + $0x6c] sm:$0xff]  }
0x1065   :  { %v1318_v42 = vadd.f32 1e-05, %v1316_v41 }
0x1066   :  { %v1339_v55 = vpop.permute.xlu0 %1338 }
0x1067   :  { %2611 = vrsqrt.f32 %v1318_v42 }
0x1070   :  { %v2610_v47 = vpop.eup %2609 }
0x1071   :  { %v1321_v52 = vmul.f32 %v2610_v47, %v3128_v61 }
0x1073   :  { %v1331_v44 = vmul.f32 %v1329_v50, %v1321_v52 }
0x1074   :  { %v2612_v26 = vpop.eup %2611 }
0x1075   :  { %v1322_v49 = vmul.f32 %v2612_v26, %v3132_v40  ;;  %v1341_v59 = vadd.f32 %v1339_v55, %v1331_v44  ;;  %v2224_v40 = vld [vmem:[%s3343_s17 + $0x2] ss:$0 sm:$0xff] }
0x1077   :  { %v1332_v60 = vmul.f32 %v1329_v50, %v1322_v49  ;;  %v1343_v0 = vmax.f32 %v1341_v59, 0.0  ;;  %v2242_v49 = vld [vmem:[%s3337_s11 + $0x3] ss:$0 sm:$0xff] }
0x1079   :  { %v1342_v39 = vadd.f32 %v1339_v55, %v1332_v60  ;;  %v1345_v4 = vsel %vm290_vm10, %v1275_v1, %v1343_v0 }
0x107b   :  { %v1344_v61 = vmax.f32 %v1342_v39, 0.0 }
0x107d   :  { %v1346_v7 = vsel %vm290_vm10, %v1276_v2, %v1344_v61 }
0x107e   :  { %v1353_v8 = vpack.c.bf16 %v1346_v7, %v1345_v4 }
0x1080   :  { %2447 = vmatmul.mubr.msk.bf16.vlgmr.msra.gmra.mxu1 %vm534_vm14, %v1353_v8 }
0x1081   :  { %2452 = vmatprep.mubr.msk.bf16.mxu1 %vm2648_vm1, %v2647_v3 }
0x1140   :  { %v1417_v9 = vpop.f32.mrf.mxu1 }
0x1141   :  { %v1418_v10 = vadd.f32 %v2224_v40, %v1417_v9 }
0x1142   :  { %v2448_v11 = vpop.f32.mrf.mxu1 }
0x1143   :  { %1474 = vrot.lane.b32.xlu1 %v1418_v10, %s2652_s3 }
0x1144   :  { %v1420_v12 = vpop.f32.mrf.mxu1 }
0x1145   :  { %v1421_v13 = vadd.f32 %v2224_v40, %v1420_v12 }
0x1146   :  { %v2449_v16 = vpop.f32.mrf.mxu1 }
0x1147   :  { %v1424_v17 = vpack.c.bf16 %v1421_v13, %v1418_v10  ;;  %1476 = vrot.lane.b32.xlu1 %v1421_v13, %s2652_s3 }
0x1149   :  { %2451 = vmatpush3.bf16.msra.mxu1 %v1424_v17 }
0x114a   :  { %2462 = vmatprep.subr.bf16.mxu1 %v2647_v3 }
0x114c   :  { %2453 = vmatmul.mubr.msk.bf16.vlgmr.msra.gmra.mxu1 %vm583_vm2, %v2941_v48 }
0x114d   :  { %2472 = vmatprep.mubr.msk.bf16.mxu1 %vm2648_vm1, %v2647_v3  ;;  %2463 = vmatpush3.bf16.msra.mxu1 %v1605_v54  ;;  %v1967_v54 = vld [vmem:[#allocation2] sm:$0x1] }
0x114e   :  { %2464 = vmatprep.subr.bf16.mxu1 %v2647_v3 }
0x1151   :  { %2465 = vmatpush3.bf16.msra.mxu1 %v2582_v36  ;;  %v2256_v36 = vld [vmem:[%s3341_s15 + $0x3] ss:$0 sm:$0xff] }
0x1152   :  { %2466 = vmatprep.subr.bf16.mxu1 %v2647_v3 }
0x11b5   :  { %v1475_v33 = vpop.permute.xlu1 %1474 }
0x11b6   :  { %v1480_v21 = vadd.f32 %v1475_v33, %v1470_v32 }
0x11b9   :  { %v1477_v19 = vpop.permute.xlu1 %1476 }
0x11ba   :  { %v1481_v22 = vadd.f32 %v1477_v19, %v1471_v18 }
0x11bc   :  { %v2552_v23 = vpack.i.bf16 %v1481_v22, %v1480_v21 }
0x11be   :  { %2553 = vrot.lane.b32.xlu1 %v2552_v23, %s2650_s8 }
0x120c   :  { %v1459_v27 = vpop.f32.mrf.mxu1 }
0x120d   :  { %v3191_v31 = vadd.f32 %v1466_v29, %v1459_v27 }
0x120e   :  { %v2454_v28 = vpop.f32.mrf.mxu1 }
0x1210   :  { %v1462_v30 = vpop.f32.mrf.mxu1 }
0x1211   :  { %v3193_v34 = vadd.f32 %v1467_v20, %v1462_v30 }
0x1212   :  { %v2455_v5 = vpop.f32.mrf.mxu1 }
0x1213   :  { %v1482_v6 = vpack.c.bf16 %v3193_v34, %v3191_v31 }
0x1215   :  { %2507 = vmatprep.subr.msk.bf16.mxu0 %vm221_vm8, %v1482_v6  ;;  %v1484_v35 = vsel %vm221_vm8, %v1482_v6, 0 }
0x1216   :  { %2457 = vmatpush3.bf16.msra.mxu0 %v1484_v35  ;;  %v2255_v35 = vld [vmem:[%s3340_s14 + $0x3] ss:$0 sm:$0xff] }
0x1217   :  { %2476 = vmatprep.subr.bf16.mxu0 %v2647_v3 }
0x1219   :  { %2459 = vmatmul.mubr.msk.bf16.vlgmr.msra.gmra.mxu0 %vm214_vm7, %v2808_v24  ;;  %v2583_v24 = vld [vmem:[%s3336_s10 + $0x7c] sm:$0xff]  }
0x121a   :  { %2482 = vmatprep.mubr.msk.bf16.mxu0 %vm2648_vm1, %v2647_v3  ;;  %2467 = vmatpush3.bf16.msra.mxu1 %v2583_v24  ;;  %v2586_v24 = vld [vmem:[%s3342_s16 + $0x4c] ss:$0 sps:$4 sm:$0xff]  }
0x121b   :  { %2468 = vmatprep.subr.bf16.mxu1 %v2647_v3 }
0x121e   :  { %2469 = vmatpush3.bf16.msra.mxu1 %v2584_v37  ;;  %v1800_v37 = vsel %vm344_vm9, %v2586_v24, 0 }
0x121f   :  { %2470 = vmatprep.subr.bf16.mxu1 %v2647_v3  ;;  %2477 = vmatpush3.bf16.msra.mxu0 %v1800_v37 }
0x1220   :  { %2478 = vmatprep.subr.bf16.mxu0 %v2647_v3 }
0x1222   :  { %2471 = vmatpush3.bf16.msra.mxu1 %v2585_v38  ;;  %v2587_v38 = vld [vmem:[%s3342_s16 + $0x44] sm:$0xff]  }
0x1223   :  { %2492 = vmatprep.subr.mxu1 %v2647_v3  ;;  %2479 = vmatpush3.bf16.msra.mxu0 %v2587_v38 }
0x1224   :  { %2480 = vmatprep.subr.bf16.mxu0 %v2647_v3 }
0x1230   :  { %v2554_v45 = vpop.permute.xlu1 %2553 }
0x1231   :  { %v2556_v51 = vunpack.i.h.bf16 %v2554_v45  ;;  %v2555_v52 = vunpack.i.l.bf16 %v2554_v45 }
0x12d9   :  { %v2460_v41 = vpop.f32.mrf.mxu0 }
0x12db   :  { %v1520_v42 = vpop.f32.mrf.mxu0 }
0x12dd   :  { %v2461_v14 = vpop.f32.mrf.mxu0 }
0x12de   :  { %v2547_v43 = vpack.i.bf16 %v2461_v14, %v2460_v41  ;;  %v2588_v41 = vld [vmem:[%s3342_s16 + $0x3c] sm:$0xff]  }
0x12df   :  { %v1523_v55 = vpop.f32.mrf.mxu0  ;;  %2481 = vmatpush3.bf16.msra.mxu0 %v2588_v41 }
0x12e0   :  { %2548 = vrot.lane.b32.xlu0 %v2547_v43, %s2651_s24  ;;  %2486 = vmatprep.subr.bf16.mxu0 %v2647_v3 }
0x1352   :  { %v2549_v46 = vpop.permute.xlu0 %2548 }
0x1353   :  { %v2551_v47 = vunpack.i.h.bf16 %v2549_v46  ;;  %v2550_v50 = vunpack.i.l.bf16 %v2549_v46 }
0x1355   :  { %v1551_v44 = vsel %vm290_vm10, %v1520_v42, %v2550_v50  ;;  %v1552_v56 = vsel %vm290_vm10, %v1523_v55, %v2551_v47 }
0x1356   :  { %v1553_v57 = vsel %vm293_vm11, %v1551_v44, %v2555_v52  ;;  %v1554_v26 = vsel %vm293_vm11, %v1552_v56, %v2556_v51 }
0x1357   :  { %v1565_v58 = vpack.c.bf16 %v1554_v26, %v1553_v57 }
0x1359   :  { %2473 = vmatmul.mubr.msk.bf16.vlgmr.msra.gmra.mxu1 %vm340_vm12, %v1565_v58 }
0x135a   :  { %2496 = vmatprep.mubr.msk.f32.mxu1 %vm2648_vm1, %v2647_v3 }
0x1419   :  { %v1641_v59 = vpop.f32.mrf.mxu1 }
0x141a   :  { %v1642_v60 = vadd.f32 %v2242_v49, %v1641_v59 }
0x141b   :  { %v2474_v62 = vpop.f32.mrf.mxu1 }
0x141c   :  { %1702 = vrot.lane.b32.xlu0 %v1642_v60, %s2652_s3  ;;  %v1652_v4 = vsel %vm290_vm10, %v1642_v60, 0.0 }
0x141d   :  { %v1644_v63 = vpop.f32.mrf.mxu1 }
0x141e   :  { %v1645_v39 = vadd.f32 %v2242_v49, %v1644_v63 }
0x141f   :  { %v2475_v0 = vpop.f32.mrf.mxu1 }
0x1420   :  { %1704 = vrot.lane.b32.xlu1 %v1645_v39, %s2652_s3  ;;  %v1655_v8 = vsel %vm290_vm10, %v1645_v39, 0.0 }
0x148e   :  { %v1703_v1 = vpop.permute.xlu0 %1702 }
0x148f   :  { %v1708_v2 = vsel %vm446_vm13, %v1703_v1, 0.0 }
0x1490   :  { %1709 = vadd.xlane.f32.xlu0 %v1708_v2 }
0x1492   :  { %v1705_v61 = vpop.permute.xlu1 %1704 }
0x1493   :  { %v1711_v7 = vsel %vm446_vm13, %v1705_v61, 0.0 }
0x1494   :  { %1653 = vadd.xlane.f32.xlu0 %v1652_v4  ;;  %1712 = vadd.xlane.f32.xlu1 %v1711_v7  ;;  %v2252_v4 = vld [vmem:[%s3339_s13 + $0x3] ss:$0 sm:$0xff] }
0x1498   :  { %1656 = vadd.xlane.f32.xlu0 %v1655_v8 }
0x1519   :  { %v1710_v40 = vpop.xlane.xlu0 %1709 }
0x151a   :  { %v1714_v9 = vmul.f32 0.125, %v1710_v40 }
0x151c   :  { %v3242_v10 = vsub.f32 %v1642_v60, %v1714_v9 }
0x151d   :  { %v1713_v11 = vpop.xlane.xlu1 %1712  ;;  %v1654_v33 = vpop.xlane.xlu0 %1653 }
0x151e   :  { %v1715_v12 = vmul.f32 0.125, %v1713_v11  ;;  %v1718_v13 = vmul.f32 %v3242_v10, %v3242_v10  ;;  %v1658_v19 = vmul.f32 0.03125, %v1654_v33 }
0x1520   :  { %v3246_v16 = vsub.f32 %v1645_v39, %v1715_v12  ;;  %1722 = vrot.lane.b32.xlu1 %v1718_v13, %s2652_s3  ;;  %v1660_v22 = vsub.f32 %v1642_v60, %v1658_v19  ;;  %v2251_v60 = vld [vmem:[%s3338_s12 + $0x3] ss:$0 sm:$0xff] }
0x1521   :  { %v1657_v32 = vpop.xlane.xlu0 %1656 }
0x1522   :  { %v1719_v17 = vmul.f32 %v3246_v16, %v3246_v16  ;;  %v1659_v18 = vmul.f32 0.03125, %v1657_v32  ;;  %v1662_v27 = vmul.f32 %v1660_v22, %v1660_v22 }
0x1524   :  { %1724 = vrot.lane.b32.xlu0 %v1719_v17, %s2652_s3  ;;  %v1661_v21 = vsub.f32 %v1645_v39, %v1659_v18  ;;  %v1664_v29 = vsel %vm290_vm10, %v1662_v27, 0.0 }
0x1526   :  { %v1663_v23 = vmul.f32 %v1661_v21, %v1661_v21 }
0x1528   :  { %v1667_v28 = vsel %vm290_vm10, %v1663_v23, 0.0 }
0x1543   :  { %1668 = vadd.xlane.f32.xlu0 %v1667_v28 }
0x1544   :  { %1665 = vadd.xlane.f32.xlu1 %v1664_v29 }
0x1592   :  { %v1723_v20 = vpop.permute.xlu1 %1722 }
0x1593   :  { %v1728_v30 = vsel %vm446_vm13, %v1723_v20, 0.0 }
0x1594   :  { %1729 = vadd.xlane.f32.xlu1 %v1728_v30 }
0x1596   :  { %v1725_v5 = vpop.permute.xlu0 %1724 }
0x1597   :  { %v1731_v6 = vsel %vm446_vm13, %v1725_v5, 0.0 }
0x1598   :  { %1732 = vadd.xlane.f32.xlu0 %v1731_v6 }
0x15a5   :  { %1747 = vrot.lane.b32.xlu1 %v2255_v35, %s2651_s24  ;;  %v1886_v35 = vmul.f32 2.0, %v3193_v34  ;;  %v1975_v34 = vsub.s32 0, %v2927_v25 }
0x15a9   :  { %118 = vperm.xlu1 %2516, %v116_v53  }
0x15ad   :  { %1970 = vperm.xlu1 %2516, %v1967_v54   ;;  %v1885_v54 = vmul.f32 2.0, %v3191_v31 }
0x15ae   :  { %1757 = vrot.lane.b32.xlu0 %v2256_v36, %s2651_s24 }
0x15cc   :  { %v1669_v42 = vpop.xlane.xlu0 %1668 }
0x15cd   :  { %v1666_v14 = vpop.xlane.xlu1 %1665  ;;  %v1671_v43 = vmul.f32 0.03125, %v1669_v42 }
0x15ce   :  { %v1670_v45 = vmul.f32 0.03125, %v1666_v14  ;;  %v2273_v14 = vld [vmem:[%s3331_s5] ss:$0 sm:$0xff]  ;;  %s2653_s5 = smov [#allocation3]  }
0x15cf   :  { %v1673_v46 = vadd.f32 1e-05, %v1671_v43 }
0x15d0   :  { %v1672_v47 = vadd.f32 1e-05, %v1670_v45 }
0x15d1   :  { %2613 = vrsqrt.f32 %v1673_v46 }
0x15d2   :  { %2615 = vrsqrt.f32 %v1672_v47 }
0x15de   :  { %v2614_v57 = vpop.eup %2613 }
0x15df   :  { %v2616_v26 = vpop.eup %2615  ;;  %v1677_v58 = vmul.f32 %v2614_v57, %v1661_v21  ;;  %v2263_v21 = vld [vmem:[%s3343_s17 + $0x3] ss:$0 sm:$0xff] }
0x15e0   :  { %v1676_v49 = vmul.f32 %v2616_v26, %v1660_v22 }
0x15e1   :  { %v1685_v2 = vmul.f32 %v2251_v60, %v1677_v58 }
0x15e2   :  { %v1684_v1 = vmul.f32 %v2251_v60, %v1676_v49 }
0x15e3   :  { %v1693_v9 = vadd.f32 %v2252_v4, %v1685_v2 }
0x15e4   :  { %v1692_v40 = vadd.f32 %v2252_v4, %v1684_v1 }
0x15e6   :  { %v1694_v17 = vmax.f32 %v1692_v40, 0.0 }
0x161d   :  { %v1730_v50 = vpop.xlane.xlu1 %1729 }
0x161e   :  { %v1734_v51 = vmul.f32 0.125, %v1730_v50 }
0x1620   :  { %v1736_v52 = vadd.f32 1e-05, %v1734_v51 }
0x1621   :  { %v1733_v55 = vpop.xlane.xlu0 %1732  ;;  %v1748_v63 = vpop.permute.xlu1 %1747 }
0x1622   :  { %2617 = vrsqrt.f32 %v1736_v52  ;;  %v1735_v44 = vmul.f32 0.125, %v1733_v55 }
0x1624   :  { %v1737_v56 = vadd.f32 1e-05, %v1735_v44 }
0x1625   :  { %v1758_v39 = vpop.permute.xlu0 %1757  ;;  %v119_v6 = vpop.permute.xlu1 %118 }
0x1626   :  { %2619 = vrsqrt.f32 %v1737_v56  ;;  %vm120_vm4 = vcmp.eq.s32.totalorder %v119_v6, %v2796_v15  ;;  %v1966_v15 = vld [vmem:[%s3344_s18] sm:$0x1]  ;;  %s2113_s18 = sshll.u32 %s2653_s5, 4  ;;  %s2114_s18 = int_to_ptr.vmem [resolvable:$true] %s2113_s18 }
0x1627   :  { %v2128_v38 = vsel %vm120_vm4, 1.0, %v2647_v3  ;;  %s2625_s22 = scalar_lea.vmem %s2114_s18, 16  ;;  %s2629_s23 = scalar_lea.vmem %s2114_s18, 32 }
0x1628   :  { %p2626_p0 = scmp.ne.s32.totalorder %s2114_s18, %s2625_s22  ;;  %p2630_p1 = scmp.lt.s32.totalorder %s2114_s18, %s2114_s18 }
0x1629   :  { %v1971_v41 = vpop.permute.xlu1 %1970  ;;  %p2631_p2 = scmp.lt.s32.totalorder %s2629_s23, %s2625_s22 }
0x162a   :  { %v1976_v42 = vrot.slane %v1971_v41, %v1975_v34 }
0x162b   :  { %p2632_p3 = por %p2631_p2, %p2630_p1 }
0x162d   :  { %p2633_p4 = pnand %p2632_p3, %p2626_p0 }
0x162f   :  { %v2618_v59 = vpop.eup %2617 }
0x1630   :  { %v1740_v62 = vmul.f32 %v2618_v59, %v3242_v10  ;;  %v1695_v10 = vmax.f32 %v1693_v9, 0.0 }
0x1632   :  { %v1750_v0 = vmul.f32 %v1748_v63, %v1740_v62 }
0x1633   :  { %v2620_v61 = vpop.eup %2619 }
0x1634   :  { %v1741_v7 = vmul.f32 %v2620_v61, %v3246_v16  ;;  %v1760_v8 = vadd.f32 %v1758_v39, %v1750_v0 }
0x1636   :  { %v1751_v11 = vmul.f32 %v1748_v63, %v1741_v7  ;;  %v1762_v13 = vmax.f32 %v1760_v8, 0.0 }
0x1638   :  { %v1761_v12 = vadd.f32 %v1758_v39, %v1751_v11  ;;  %v1764_v32 = vsel %vm290_vm10, %v1694_v17, %v1762_v13 }
0x163a   :  { %v1763_v33 = vmax.f32 %v1761_v12, 0.0 }
0x163c   :  { %v1765_v18 = vsel %vm290_vm10, %v1695_v10, %v1763_v33 }
0x163d   :  { %v1772_v19 = vpack.c.bf16 %v1765_v18, %v1764_v32 }
0x163f   :  { %2483 = vmatmul.mubr.msk.bf16.vlgmr.msra.gmra.mxu0 %vm534_vm14, %v1772_v19 }
0x1640   :  { %2488 = vmatprep.mubr.msk.bf16.mxu0 %vm2648_vm1, %v2647_v3 }
0x16ff   :  { %v1836_v16 = vpop.f32.mrf.mxu0 }
0x1700   :  { %v1837_v27 = vadd.f32 %v2263_v21, %v1836_v16 }
0x1701   :  { %v2484_v22 = vpop.f32.mrf.mxu0 }
0x1703   :  { %v1839_v23 = vpop.f32.mrf.mxu0 }
0x1704   :  { %v1840_v28 = vadd.f32 %v2263_v21, %v1839_v23 }
0x1705   :  { %v2485_v29 = vpop.f32.mrf.mxu0 }
0x1706   :  { %v1843_v20 = vpack.c.bf16 %v1840_v28, %v1837_v27 }
0x1708   :  { %2487 = vmatpush3.bf16.msra.mxu0 %v1843_v20 }
0x170b   :  { %2489 = vmatmul.mubr.msk.bf16.vlgmr.msra.gmra.mxu0 %vm583_vm2, %v2941_v48 }
0x17cb   :  { %v1878_v30 = vpop.f32.mrf.mxu0 }
0x17cc   :  { %v1887_v37 = vadd.f32 %v1885_v54, %v1878_v30 }
0x17cd   :  { %v2490_v5 = vpop.f32.mrf.mxu0 }
0x17cf   :  { %v1881_v53 = vpop.f32.mrf.mxu0 }
0x17d0   :  { %v1888_v36 = vadd.f32 %v1886_v35, %v1881_v53 }
0x17d1   :  { %v2491_v24 = vpop.f32.mrf.mxu0 }
0x17d2   :  { %2493 = vmatpush3.msk.msra.mxu1 %vm1892_vm3, %v1888_v36 }
0x17d3   :  { %2494 = vmatprep.subr.mxu1 %v2647_v3 }
0x17d4   :  { %2495 = vmatpush3.msra.mxu1 %v1887_v37 }
0x17d5   :  { %2497 = vmatmul.mubr.msk.f32.vlgmr.msra.gmra.mxu1 %vm214_vm7, %v2128_v38  ;;  %2499 = vmatprep.subr.mxu1 %v2647_v3  ;;  %vm2105_vm7 = vcmask 40960  }
0x17d6   :  { %2501 = vmatprep.mubr.msk.f32.mxu1 %vm2648_vm1, %v2647_v3  ;;  %vm2058_vm1 = vcmp.eq.s32.totalorder %v2927_v25, %v2273_v14 }
0x17d7   :  { %v2274_v52 = vsel %vm2058_vm1, 1.0, %v2647_v3 }
0x17d8   :  { %v2089_v55 = vsel %vm2066_vm5, %v2274_v52, 0.0 }
0x17d9   :  { %2090 = vadd.xlane.f32.xlu1 %v2089_v55 }
0x1862   :  { %v2091_v2 = vpop.xlane.xlu1 %2090 }
0x1863   :  { %vm2092_vm6 = vcmp.gt.f32.partialorder %v2091_v2, 0.0 }
0x1895   :  { %v1962_v48 = vpop.f32.mrf.mxu1 }
0x1896   :  { %2500 = vmatpush3.xpose.msk.msra.mxu1 %vm290_vm10, %v1962_v48 }
0x1897   :  { %v2498_v31 = vpop.f32.mrf.mxu1 }
0x1899   :  { %2502 = vmatmul.mubr.msk.f32.vlgmr.msra.gmra.mxu1 %vm290_vm10, %v1966_v15 }
0x1959   :  { %v2049_v43 = vpop.f32.mrf.mxu1 }
0x195a   :  { %v2050_v45 = vadd.f32 %v2049_v43, %v1976_v42 }
0x195b   :  { %v2503_v46 = vpop.f32.mrf.mxu1 }
0x195c   :  { %v2064_v47 = vrot.slane %v2050_v45, %v1975_v34 }
0x195e   :  { %v2065_v50 = vsel %vm2058_vm1, %v2064_v47, -1e+30 }
0x195f   :  { %v2067_v51 = vsel %vm2066_vm5, %v2065_v50, -inf }
0x1960   :  { %2068 = vmax.xlane.f32.xlu0 %v2067_v51 }
0x19e9   :  { %v2069_v44 = vpop.xlane.xlu0 %2068 }
0x19ea   :  { %v2070_v56 = vmul.f32 %v2274_v52, %v2069_v44 }
0x19ec   :  { %v2071_v57 = vsel %vm2066_vm5, %v2070_v56, 0.0 }
0x19ed   :  { %v2072_v26 = vrot.slane %v2071_v57, 4 }
0x19ef   :  { %v2073_v58 = vadd.f32 %v2072_v26, %v2071_v57 }
0x19f1   :  { %v2074_v49 = vrot.slane %v2073_v58, 2 }
0x19f3   :  { %v2075_v59 = vadd.f32 %v2074_v49, %v2073_v58 }
0x19f5   :  { %v2076_v25 = vrot.slane %v2075_v59, 1 }
0x19f7   :  { %v2077_v60 = vadd.f32 %v2076_v25, %v2075_v59 }
0x19f9   :  { %v2078_v62 = vsub.f32 %v2050_v45, %v2077_v60 }
0x19fb   :  { %v2079_v63 = vmul.f32 1.442695, %v2078_v62 }
0x19fd   :  { %2621 = vpow2.f32 %v2079_v63 }
0x1a0a   :  { %v2622_v39 = vpop.eup %2621 }
0x1a0b   :  { %v2084_v0 = vrot.slane %v2622_v39, %v1975_v34 }
0x1a0d   :  { %v2085_v1 = vmul.f32 %v2274_v52, %v2084_v0 }
0x1a0f   :  { %v2086_v3 = vsel %vm2066_vm5, %v2085_v1, 0.0 }
0x1a10   :  { %2087 = vadd.xlane.f32.xlu0 %v2086_v3 }
0x1a99   :  { %v2088_v61 = vpop.xlane.xlu0 %2087 }
0x1a9a   :  { %v2093_v4 = vsel %vm2092_vm6, %v2088_v61, 1.0 }
0x1a9b   :  { %2623 = vlog2.f32 %v2093_v4 }
0x1aa8   :  { %v2624_v7 = vpop.eup %2623 }
0x1aa9   :  { %v2095_v8 = vmul.f32 0.6931472, %v2624_v7 }
0x1aab   :  { %v2096_v40 = vmul.f32 %v2274_v52, %v2095_v8 }
0x1aad   :  { %v2097_v9 = vsel %vm2066_vm5, %v2096_v40, 0.0 }
0x1aae   :  { %v2098_v11 = vrot.slane %v2097_v9, 4 }
0x1ab0   :  { %v2099_v12 = vadd.f32 %v2098_v11, %v2097_v9 }
0x1ab2   :  { %v2100_v13 = vrot.slane %v2099_v12, 2 }
0x1ab4   :  { %v2101_v17 = vadd.f32 %v2100_v13, %v2099_v12 }
0x1ab6   :  { %v2102_v10 = vrot.slane %v2101_v17, 1 }
0x1ab8   :  { %v2103_v33 = vadd.f32 %v2102_v10, %v2101_v17 }
0x1aba   :  { %v2104_v32 = vsub.f32 %v2078_v62, %v2103_v33 }
0x1abc   :  { %2106 = vst.msk [vmem:[#allocation3] sm:$0x1] %vm2105_vm7, %v2104_v32 }
0x1abd   :  { %2636 = shalt.err (!%p2633_p4)
}
0x1abe   :  { %2116 = dma.vmem_to_hbm [thread:$0]  %s2114_s18, 16, %s3346_s20, [#allocation4]  }
0x1abf   :  { %2645 = dma.done.wait [#allocation4], 16  }
0x1ac0   :  { %2646 = vsyncadd [#allocation4], 4294967280 }
0x1ac1   :  { %2120 = vsyncpa [#allocation4], 1 }

</bundles_post_ra>
